<compile_context>
chip_gen: v7x
topology: tpu7x:2x2x1
jax: 0.10.0
libtpu: 0.0.40
codegen_flags: <defaults>
</compile_context>

<pallas_src>
import math
import functools

import jax
import jax.numpy as jnp
from jax.experimental import pallas as pl
from jax.experimental.pallas import tpu as pltpu


def encoder_block_kernel(lens_ref, x_ref, wqkv_ref, bqkv_ref, wo_ref, bo_ref,
                         ln1_g_ref, ln1_b_ref,
                         w1_ref, b1_ref, w2_ref, b2_ref,
                         ln2_g_ref, ln2_b_ref,
                         out_ref,
                         *, n_heads, block_b, approx_recip):
    Bt = block_b
    H = n_heads
    S = x_ref.shape[1]
    D = x_ref.shape[2]
    dh = D // H
    cdt = wqkv_ref.dtype                      # MXU compute dtype (f32 or bf16)

    # ---- load the whole (Bt, S, D) block; collapsing leading dims is layout-free ----
    x = x_ref[...].reshape(Bt * S, D)                                   # f32

    # ---- fused QKV projection (1/sqrt(dh) pre-folded into the Wq/bq columns) ----
    qkv = jnp.dot(x.astype(cdt), wqkv_ref[...],
                  preferred_element_type=jnp.float32) + bqkv_ref[...]   # (Bt*S, 3D) f32

    def to_heads(cols):
        # (Bt*S, D) -> (Bt*H, S, dh): one reshape + one relayout (transpose), no
        # per-head Python slicing / stacking.
        t = cols.astype(cdt).reshape(Bt, S, H, dh)
        return jnp.transpose(t, (0, 2, 1, 3)).reshape(Bt * H, S, dh)

    qh = to_heads(qkv[:, 0 * D:1 * D])
    kh = to_heads(qkv[:, 1 * D:2 * D])
    vh = to_heads(qkv[:, 2 * D:3 * D])

    # scores[bh, q, k] = sum_d qh[bh, q, d] * kh[bh, k, d]  (batched; no explicit .T)
    scores = jax.lax.dot_general(
        qh, kh, dimension_numbers=(((2,), (2,)), ((0,), (0,))),
        preferred_element_type=jnp.float32).reshape(Bt, H, S, S)        # f32

    # ---- key-validity mask: small boolean (Bt,1,1,S); heads / query rows broadcast
    #      implicitly inside jnp.where (no (Bt*H,S,S) float mask is materialized) ----
    key_pos = jax.lax.broadcasted_iota(jnp.int32, (1, 1, 1, S), 3)
    valid = key_pos < lens_ref[...]                                     # (Bt,1,1,S) bool

    # TODO(synk): for large S, add an 'arbitrary' key-tile grid axis with online-softmax
    # accumulation and use pl.when + lens to skip fully-masked key tiles.
    scores = jnp.where(valid, scores, -1e6)
    scores = scores - jnp.max(scores, axis=-1, keepdims=True)
    p = jnp.exp(scores)                                   # f32 (v5e EUP has no bf16)
    denom = jnp.sum(p, axis=-1, keepdims=True)
    p = p * pl.reciprocal(denom, approx=approx_recip)     # EUP slot, not a VPU divide
    # TODO(synk): attention-weight dropout is identity (eval mode).

    o = jax.lax.dot_general(
        p.reshape(Bt * H, S, S).astype(cdt), vh,
        dimension_numbers=(((2,), (1,)), ((0,), (0,))),
        preferred_element_type=jnp.float32)                             # (Bt*H, S, dh) f32

    # ---- merge heads with a single relayout (no lane-axis concatenations), then one
    #      MXU matmul against the (D, D) output projection ----
    attn = jnp.transpose(o.reshape(Bt, H, S, dh), (0, 2, 1, 3)).reshape(Bt * S, D)
    attn_out = jnp.dot(attn.astype(cdt), wo_ref[...],
                       preferred_element_type=jnp.float32) + bo_ref[...]

    def layer_norm(z, g, beta):                           # f32 VPU/EUP math
        mean = jnp.mean(z, axis=-1, keepdims=True)
        c = z - mean
        var = jnp.mean(c * c, axis=-1, keepdims=True)
        return c * jax.lax.rsqrt(var + 1e-5) * g + beta

    # AddAndNorm 1 (dropout = identity in eval mode)
    y = layer_norm(x + attn_out, ln1_g_ref[...], ln1_b_ref[...])

    # FFN: relu(y @ W1 + b1) @ W2 + b2
    # TODO(synk): for large F on v7x (64 MiB VMEM), tile F on a second 'arbitrary' grid
    # axis with an f32 accumulator instead of keeping W1/W2 fully resident.
    h1 = jnp.maximum(
        jnp.dot(y.astype(cdt), w1_ref[...],
                preferred_element_type=jnp.float32) + b1_ref[...], 0.0)
    ffn_out = jnp.dot(h1.astype(cdt), w2_ref[...],
                      preferred_element_type=jnp.float32) + b2_ref[...]

    # AddAndNorm 2; leading-dim reshape for the store is layout-free.
    out = layer_norm(y + ffn_out, ln2_g_ref[...], ln2_b_ref[...])
    out_ref[...] = out.reshape(Bt, S, D).astype(out_ref.dtype)
    # TODO(synk): when D % 128 != 0 (toy sizes only) the store is a masked vst; a
    # lane-dense (block_b, S*D) output layout would avoid that.  At D % 128 == 0
    # (realistic hidden sizes) stores are already lane-dense.


def pack_params(params, *, n_heads, compute_dtype=jnp.float32):
    """One-time packing: fuse Wq|Wk|Wv, fold 1/sqrt(d_head) into Wq/bq, and cast
    matmul weights to the MXU compute dtype.  Biases / LayerNorm params stay f32."""
    D = params["wq"].shape[0]
    dh = D // n_heads
    scale = 1.0 / math.sqrt(dh)
    f32 = jnp.float32
    wqkv = jnp.concatenate([params["wq"] * scale, params["wk"], params["wv"]], axis=1)
    bqkv = jnp.concatenate([params["bq"] * scale, params["bk"], params["bv"]], axis=1)
    return {
        "wqkv": wqkv.astype(compute_dtype),
        "bqkv": bqkv.astype(f32),
        "wo": params["wo"].astype(compute_dtype), "bo": params["bo"].astype(f32),
        "ln1_g": params["ln1_g"].astype(f32), "ln1_b": params["ln1_b"].astype(f32),
        "w1": params["w1"].astype(compute_dtype), "b1": params["b1"].astype(f32),
        "w2": params["w2"].astype(compute_dtype), "b2": params["b2"].astype(f32),
        "ln2_g": params["ln2_g"].astype(f32), "ln2_b": params["ln2_b"].astype(f32),
    }


def _min_grid_steps():
    """v7x has 2 TensorCores per chip: keep >= 2 'parallel' grid steps so both get
    work.  v5e / v6e have a single TC, where extra grid steps are pure per-step
    pipeline overhead (~0.35 us each)."""
    try:
        kind = jax.devices()[0].device_kind.lower()
    except Exception:
        return 1
    return 2 if "v7" in kind else 1


def _pick_block_b(B, S, max_rows=512, min_grid_steps=1):
    """Pack batch rows per grid step (amortize per-step overhead, fill MXU M rows).
    At realistic sizes aim for block_b*S a multiple of 256 (v6e/v7x MXU) / 128 (v5e)."""
    cands = [c for c in range(1, B + 1) if B % c == 0 and c * S <= max_rows]
    if not cands:
        return 1
    multi = [c for c in cands if B // c >= min_grid_steps]
    pool = multi if multi else cands
    return max(pool)


def _default_vmem_limit_bytes():
    """~100 MiB scoped limit on 128-MiB parts (v5e/v6e); ~3/4 of capacity (≈48 MiB)
    on 64-MiB parts (v7x)."""
    try:
        cap = pltpu.get_tpu_info().vmem_capacity_bytes
        return min(100 * 1024 * 1024, (cap * 3) // 4)
    except Exception:
        return 48 * 1024 * 1024


def _cost_estimate(B, S, D, F, H):
    proj_flops = 2 * B * S * D * (3 * D + D)        # fused QKV + output projection
    attn_flops = 2 * 2 * B * S * S * D              # QK^T and PV
    ffn_flops = 2 * 2 * B * S * D * F               # W1 and W2
    transcendentals = B * H * S * S + 2 * B * S     # softmax exp + LayerNorm rsqrt
    bytes_accessed = (4 * 2 * B * S * D             # x in + out
                      + 4 * (4 * D * D + 2 * D * F) # projection + FFN weights
                      + 4 * (12 * D + F)            # biases + LN params
                      + 4 * B)                      # lens
    return pl.CostEstimate(flops=proj_flops + attn_flops + ffn_flops,
                           transcendentals=transcendentals,
                           bytes_accessed=bytes_accessed)


def encoder_block(x, lens, packed, *, n_heads, block_b=None, approx_recip=True,
                  vmem_limit_bytes=None, single_buffer_weights=False):
    B, S, D = x.shape
    F = packed["w1"].shape[1]
    if block_b is None:
        block_b = _pick_block_b(B, S, min_grid_steps=_min_grid_steps())
    assert B % block_b == 0, "block_b must divide the batch size"
    grid = (B // block_b,)
    if vmem_limit_bytes is None:
        vmem_limit_bytes = _default_vmem_limit_bytes()

    # lens as a tiny (B,1,1,1) int32 VMEM input -> fully vectorized in-kernel mask
    # build (last two block dims equal the full array dims, so any block_b is legal).
    lens4 = lens.astype(jnp.int32).reshape(B, 1, 1, 1)

    def wspec(shape):
        idx = lambda i: (0,) * len(shape)
        if single_buffer_weights:
            # v7x (64 MiB VMEM): constant-indexed weights don't need double-buffering.
            return pl.BlockSpec(shape, idx, pipeline_mode=pl.Buffered(1))
        return pl.BlockSpec(shape, idx)

    grid_spec = pltpu.PrefetchScalarGridSpec(
        num_scalar_prefetch=0,
        grid=grid,
        in_specs=[
            pl.BlockSpec((block_b, 1, 1, 1), lambda i: (i, 0, 0, 0)),   # lens
            pl.BlockSpec((block_b, S, D), lambda i: (i, 0, 0)),         # x
            wspec((D, 3 * D)), wspec((1, 3 * D)),      # wqkv, bqkv
            wspec((D, D)), wspec((1, D)),              # wo, bo
            wspec((1, D)), wspec((1, D)),              # ln1 gamma / beta
            wspec((D, F)), wspec((1, F)),              # w1, b1
            wspec((F, D)), wspec((1, D)),              # w2, b2
            wspec((1, D)), wspec((1, D)),              # ln2 gamma / beta
        ],
        out_specs=pl.BlockSpec((block_b, S, D), lambda i: (i, 0, 0)),
    )

    kernel = functools.partial(
        encoder_block_kernel,
        n_heads=n_heads, block_b=block_b, approx_recip=bool(approx_recip))

    return pl.pallas_call(
        kernel,
        out_shape=jax.ShapeDtypeStruct((B, S, D), x.dtype),
        grid_spec=grid_spec,
        cost_estimate=_cost_estimate(B, S, D, F, n_heads),
        compiler_params=pltpu.CompilerParams(
            dimension_semantics=("parallel",),
            vmem_limit_bytes=vmem_limit_bytes),
    )(lens4, x,
      packed["wqkv"], packed["bqkv"], packed["wo"], packed["bo"],
      packed["ln1_g"], packed["ln1_b"],
      packed["w1"], packed["b1"], packed["w2"], packed["b2"],
      packed["ln2_g"], packed["ln2_b"])


def encoder_block_ref(x, lens, params, *, n_heads):
    """Pure-JAX reference of the same math (for a sanity check)."""
    B, S, D = x.shape
    dh = D // n_heads

    def ln(z, g, b):
        mean = jnp.mean(z, -1, keepdims=True)
        var = jnp.mean((z - mean) ** 2, -1, keepdims=True)
        return (z - mean) / jnp.sqrt(var + 1e-5) * g + b

    q = x @ params["wq"] + params["bq"]
    k = x @ params["wk"] + params["bk"]
    v = x @ params["wv"] + params["bv"]

    def split(t):  # (B,S,D) -> (B,H,S,dh)
        return t.reshape(B, S, n_heads, dh).transpose(0, 2, 1, 3)

    qh, kh, vh = split(q), split(k), split(v)
    scores = jnp.einsum("bhqd,bhkd->bhqk", qh, kh) / math.sqrt(dh)
    valid = jnp.arange(S)[None, None, None, :] < lens[:, None, None, None]
    scores = jnp.where(valid, scores, -1e6)
    p = jax.nn.softmax(scores, axis=-1)
    o = jnp.einsum("bhqk,bhkd->bhqd", p, vh).transpose(0, 2, 1, 3).reshape(B, S, D)
    attn_out = o @ params["wo"] + params["bo"]

    y = ln(x + attn_out, params["ln1_g"], params["ln1_b"])
    ffn = jnp.maximum(y @ params["w1"] + params["b1"], 0.0) @ params["w2"] + params["b2"]
    return ln(y + ffn, params["ln2_g"], params["ln2_b"])


if __name__ == "__main__":
    B, S, D, H, F = 2, 8, 32, 4, 64   # batch, seq, n_hidden, heads, ffn_hidden

    key = jax.random.PRNGKey(0)
    keys = jax.random.split(key, 16)

    def w(k, shape):
        return jax.random.normal(k, shape, jnp.float32) * 0.1

    params = {
        "wq": w(keys[0], (D, D)), "bq": w(keys[1], (1, D)),
        "wk": w(keys[2], (D, D)), "bk": w(keys[3], (1, D)),
        "wv": w(keys[4], (D, D)), "bv": w(keys[5], (1, D)),
        "wo": w(keys[6], (D, D)), "bo": w(keys[7], (1, D)),
        "ln1_g": jnp.ones((1, D), jnp.float32), "ln1_b": jnp.zeros((1, D), jnp.float32),
        "w1": w(keys[8], (D, F)), "b1": w(keys[9], (1, F)),
        "w2": w(keys[10], (F, D)), "b2": w(keys[11], (1, D)),
        "ln2_g": jnp.ones((1, D), jnp.float32), "ln2_b": jnp.zeros((1, D), jnp.float32),
    }

    x = jax.random.normal(keys[12], (B, S, D), jnp.float32)
    lens = jnp.array([5, 8], dtype=jnp.int32)

    ref = encoder_block_ref(x, lens, params, n_heads=H)

    packed_f32 = pack_params(params, n_heads=H, compute_dtype=jnp.float32)

    # 1) f32 MXU path, exact reciprocal, auto block size -> validates the math tightly.
    out = jax.block_until_ready(
        encoder_block(x, lens, packed_f32, n_heads=H, approx_recip=False))
    assert out.shape == (B, S, D)
    assert jnp.allclose(out, ref, atol=1e-4, rtol=1e-4), "f32 kernel mismatch"

    # 2) default path: EUP approx reciprocal, both batch rows packed into one grid step.
    out_packed = jax.block_until_ready(
        encoder_block(x, lens, packed_f32, n_heads=H, block_b=2))
    assert jnp.allclose(out_packed, ref, atol=5e-3, rtol=5e-3), "block_b=2 mismatch"

    # 3) bf16 MXU operands (f32 accumulation, f32 softmax/LayerNorm) — v6e/v7x fast path.
    packed_bf16 = pack_params(params, n_heads=H, compute_dtype=jnp.bfloat16)
    out_bf16 = jax.block_until_ready(encoder_block(x, lens, packed_bf16, n_heads=H))
    assert jnp.allclose(out_bf16, ref, atol=5e-2, rtol=5e-2), "bf16 kernel mismatch"

    print("KERNEL_OK")
</pallas_src>

<mosaic_0001>
module attributes {stable_mosaic.version = 11 : i64} {
  func.func @encoder_block_kernel(%arg0: i32, %arg1: memref<2x1x1x1xi32, #tpu.memory_space<vmem>>, %arg2: memref<2x8x32xf32, #tpu.memory_space<vmem>>, %arg3: memref<32x96xf32, #tpu.memory_space<vmem>>, %arg4: memref<1x96xf32, #tpu.memory_space<vmem>>, %arg5: memref<32x32xf32, #tpu.memory_space<vmem>>, %arg6: memref<1x32xf32, #tpu.memory_space<vmem>>, %arg7: memref<1x32xf32, #tpu.memory_space<vmem>>, %arg8: memref<1x32xf32, #tpu.memory_space<vmem>>, %arg9: memref<32x64xf32, #tpu.memory_space<vmem>>, %arg10: memref<1x64xf32, #tpu.memory_space<vmem>>, %arg11: memref<64x32xf32, #tpu.memory_space<vmem>>, %arg12: memref<1x32xf32, #tpu.memory_space<vmem>>, %arg13: memref<1x32xf32, #tpu.memory_space<vmem>>, %arg14: memref<1x32xf32, #tpu.memory_space<vmem>>, %arg15: memref<2x8x32xf32, #tpu.memory_space<vmem>>) attributes {dimension_semantics = [#tpu.dimension_semantics<parallel>], iteration_bounds = array<i64: 1>, scalar_prefetch = 0 : i64, scratch_operands = 0 : i64, tpu.core_type = #tpu.core_type<tc>, window_params = [{transform_indices = @transform_0, window_bounds = array<i64: 2, 1, 1, 1>}, {transform_indices = @transform_1, window_bounds = array<i64: 2, 8, 32>}, {pipeline_mode = #tpu.pipeline_mode<synchronous>, transform_indices = @transform_2, window_bounds = array<i64: 32, 96>}, {pipeline_mode = #tpu.pipeline_mode<synchronous>, transform_indices = @transform_3, window_bounds = array<i64: 1, 96>}, {pipeline_mode = #tpu.pipeline_mode<synchronous>, transform_indices = @transform_4, window_bounds = array<i64: 32, 32>}, {pipeline_mode = #tpu.pipeline_mode<synchronous>, transform_indices = @transform_5, window_bounds = array<i64: 1, 32>}, {pipeline_mode = #tpu.pipeline_mode<synchronous>, transform_indices = @transform_6, window_bounds = array<i64: 1, 32>}, {pipeline_mode = #tpu.pipeline_mode<synchronous>, transform_indices = @transform_7, window_bounds = array<i64: 1, 32>}, {pipeline_mode = #tpu.pipeline_mode<synchronous>, transform_indices = @transform_8, window_bounds = array<i64: 32, 64>}, {pipeline_mode = #tpu.pipeline_mode<synchronous>, transform_indices = @transform_9, window_bounds = array<i64: 1, 64>}, {pipeline_mode = #tpu.pipeline_mode<synchronous>, transform_indices = @transform_10, window_bounds = array<i64: 64, 32>}, {pipeline_mode = #tpu.pipeline_mode<synchronous>, transform_indices = @transform_11, window_bounds = array<i64: 1, 32>}, {pipeline_mode = #tpu.pipeline_mode<synchronous>, transform_indices = @transform_12, window_bounds = array<i64: 1, 32>}, {pipeline_mode = #tpu.pipeline_mode<synchronous>, transform_indices = @transform_13, window_bounds = array<i64: 1, 32>}, {transform_indices = @transform_14, window_bounds = array<i64: 2, 8, 32>}]} {
    %c0 = arith.constant 0 : index
    %c0_0 = arith.constant 0 : index
    %c0_1 = arith.constant 0 : index
    %0 = vector.load %arg2[%c0, %c0_0, %c0_1] : memref<2x8x32xf32, #tpu.memory_space<vmem>>, vector<2x8x32xf32>
    %1 = vector.shape_cast %0 : vector<2x8x32xf32> to vector<16x32xf32>
    %c0_2 = arith.constant 0 : index
    %c0_3 = arith.constant 0 : index
    %2 = vector.load %arg3[%c0_2, %c0_3] : memref<32x96xf32, #tpu.memory_space<vmem>>, vector<32x96xf32>
    %cst = arith.constant dense<0.000000e+00> : vector<16x96xf32>
    %3 = tpu.matmul %1, %2, %cst {dimension_numbers = #tpu.dot_dimension_numbers<[1], [0], [0], [1], [0, 0, 1, 1], [], []>} : vector<16x32xf32>, vector<32x96xf32>, vector<16x96xf32> -> vector<16x96xf32>
    %c0_4 = arith.constant 0 : index
    %c0_5 = arith.constant 0 : index
    %4 = vector.load %arg4[%c0_4, %c0_5] : memref<1x96xf32, #tpu.memory_space<vmem>>, vector<1x96xf32>
    %5 = vector.broadcast %4 : vector<1x96xf32> to vector<16x96xf32>
    %6 = arith.addf %3, %5 : vector<16x96xf32>
    %7 = vector.extract_strided_slice %6 {offsets = [0, 0], sizes = [16, 32], strides = [1, 1]} : vector<16x96xf32> to vector<16x32xf32>
    %8 = vector.shape_cast %7 : vector<16x32xf32> to vector<2x8x4x8xf32>
    %9 = tpu.transpose %8, [0, 2, 1, 3] : vector<2x8x4x8xf32> -> vector<2x4x8x8xf32>
    %10 = vector.shape_cast %9 : vector<2x4x8x8xf32> to vector<8x8x8xf32>
    %11 = vector.extract_strided_slice %6 {offsets = [0, 32], sizes = [16, 32], strides = [1, 1]} : vector<16x96xf32> to vector<16x32xf32>
    %12 = vector.shape_cast %11 : vector<16x32xf32> to vector<2x8x4x8xf32>
    %13 = tpu.transpose %12, [0, 2, 1, 3] : vector<2x8x4x8xf32> -> vector<2x4x8x8xf32>
    %14 = vector.shape_cast %13 : vector<2x4x8x8xf32> to vector<8x8x8xf32>
    %15 = vector.extract_strided_slice %6 {offsets = [0, 64], sizes = [16, 32], strides = [1, 1]} : vector<16x96xf32> to vector<16x32xf32>
    %16 = vector.shape_cast %15 : vector<16x32xf32> to vector<2x8x4x8xf32>
    %17 = tpu.transpose %16, [0, 2, 1, 3] : vector<2x8x4x8xf32> -> vector<2x4x8x8xf32>
    %18 = vector.shape_cast %17 : vector<2x4x8x8xf32> to vector<8x8x8xf32>
    %cst_6 = arith.constant dense<0.000000e+00> : vector<8x8x8xf32>
    %19 = tpu.matmul %10, %14, %cst_6 {dimension_numbers = #tpu.dot_dimension_numbers<[2], [2], [1], [1], [0, 0, 0, 1, 1, 1], [0], [0]>} : vector<8x8x8xf32>, vector<8x8x8xf32>, vector<8x8x8xf32> -> vector<8x8x8xf32>
    %20 = vector.shape_cast %19 : vector<8x8x8xf32> to vector<2x4x8x8xf32>
    %21 = tpu.iota {dimensions = array<i32: 3>} : vector<1x1x1x8xi32>
    %c0_7 = arith.constant 0 : index
    %c0_8 = arith.constant 0 : index
    %c0_9 = arith.constant 0 : index
    %c0_10 = arith.constant 0 : index
    %22 = vector.load %arg1[%c0_7, %c0_8, %c0_9, %c0_10] : memref<2x1x1x1xi32, #tpu.memory_space<vmem>>, vector<2x1x1x1xi32>
    %23 = vector.broadcast %21 : vector<1x1x1x8xi32> to vector<2x1x1x8xi32>
    %24 = vector.broadcast %22 : vector<2x1x1x1xi32> to vector<2x1x1x8xi32>
    %25 = arith.cmpi slt, %23, %24 : vector<2x1x1x8xi32>
    %cst_11 = arith.constant -1.000000e+06 : f32
    %26 = vector.shape_cast %25 : vector<2x1x1x8xi1> to vector<2x1x1x8xi1>
    %27 = vector.broadcast %26 : vector<2x1x1x8xi1> to vector<2x4x8x8xi1>
    %28 = vector.broadcast %cst_11 : f32 to vector<2x4x8x8xf32>
    %29 = arith.select %27, %20, %28 : vector<2x4x8x8xi1>, vector<2x4x8x8xf32>
    %cst_12 = arith.constant dense<0xFF800000> : vector<2x4x8xf32>
    %30 = vector.multi_reduction <maximumf>, %29, %cst_12 [3] : vector<2x4x8x8xf32> to vector<2x4x8xf32>
    %31 = vector.shape_cast %30 : vector<2x4x8xf32> to vector<2x4x8x1xf32>
    %32 = vector.broadcast %31 : vector<2x4x8x1xf32> to vector<2x4x8x8xf32>
    %33 = arith.subf %29, %32 : vector<2x4x8x8xf32>
    %34 = math.exp %33 : vector<2x4x8x8xf32>
    %cst_13 = arith.constant dense<0.000000e+00> : vector<2x4x8xf32>
    %35 = vector.multi_reduction <add>, %34, %cst_13 [3] : vector<2x4x8x8xf32> to vector<2x4x8xf32>
    %36 = vector.shape_cast %35 : vector<2x4x8xf32> to vector<2x4x8x1xf32>
    %37 = tpu.reciprocal %36 : vector<2x4x8x1xf32> -> vector<2x4x8x1xf32>
    %38 = vector.broadcast %37 : vector<2x4x8x1xf32> to vector<2x4x8x8xf32>
    %39 = arith.mulf %34, %38 : vector<2x4x8x8xf32>
    %40 = vector.shape_cast %39 : vector<2x4x8x8xf32> to vector<8x8x8xf32>
    %cst_14 = arith.constant dense<0.000000e+00> : vector<8x8x8xf32>
    %41 = tpu.matmul %40, %18, %cst_14 {dimension_numbers = #tpu.dot_dimension_numbers<[2], [1], [1], [2], [0, 0, 0, 1, 1, 2], [0], [0]>} : vector<8x8x8xf32>, vector<8x8x8xf32>, vector<8x8x8xf32> -> vector<8x8x8xf32>
    %42 = vector.shape_cast %41 : vector<8x8x8xf32> to vector<2x4x8x8xf32>
    %43 = tpu.transpose %42, [0, 2, 1, 3] : vector<2x4x8x8xf32> -> vector<2x8x4x8xf32>
    %44 = vector.shape_cast %43 : vector<2x8x4x8xf32> to vector<16x32xf32>
    %c0_15 = arith.constant 0 : index
    %c0_16 = arith.constant 0 : index
    %45 = vector.load %arg5[%c0_15, %c0_16] : memref<32x32xf32, #tpu.memory_space<vmem>>, vector<32x32xf32>
    %cst_17 = arith.constant dense<0.000000e+00> : vector<16x32xf32>
    %46 = tpu.matmul %44, %45, %cst_17 {dimension_numbers = #tpu.dot_dimension_numbers<[1], [0], [0], [1], [0, 0, 1, 1], [], []>} : vector<16x32xf32>, vector<32x32xf32>, vector<16x32xf32> -> vector<16x32xf32>
    %c0_18 = arith.constant 0 : index
    %c0_19 = arith.constant 0 : index
    %47 = vector.load %arg6[%c0_18, %c0_19] : memref<1x32xf32, #tpu.memory_space<vmem>>, vector<1x32xf32>
    %48 = vector.broadcast %47 : vector<1x32xf32> to vector<16x32xf32>
    %49 = arith.addf %46, %48 : vector<16x32xf32>
    %50 = arith.addf %1, %49 : vector<16x32xf32>
    %c0_20 = arith.constant 0 : index
    %c0_21 = arith.constant 0 : index
    %51 = vector.load %arg7[%c0_20, %c0_21] : memref<1x32xf32, #tpu.memory_space<vmem>>, vector<1x32xf32>
    %c0_22 = arith.constant 0 : index
    %c0_23 = arith.constant 0 : index
    %52 = vector.load %arg8[%c0_22, %c0_23] : memref<1x32xf32, #tpu.memory_space<vmem>>, vector<1x32xf32>
    %cst_24 = arith.constant dense<0.000000e+00> : vector<16xf32>
    %53 = vector.multi_reduction <add>, %50, %cst_24 [1] : vector<16x32xf32> to vector<16xf32>
    %54 = vector.shape_cast %53 : vector<16xf32> to vector<16x1xf32>
    %cst_25 = arith.constant 3.200000e+01 : f32
    %55 = vector.broadcast %cst_25 : f32 to vector<16x1xf32>
    %56 = arith.divf %54, %55 : vector<16x1xf32>
    %57 = vector.broadcast %56 : vector<16x1xf32> to vector<16x32xf32>
    %58 = arith.subf %50, %57 : vector<16x32xf32>
    %59 = arith.mulf %58, %58 : vector<16x32xf32>
    %cst_26 = arith.constant dense<0.000000e+00> : vector<16xf32>
    %60 = vector.multi_reduction <add>, %59, %cst_26 [1] : vector<16x32xf32> to vector<16xf32>
    %61 = vector.shape_cast %60 : vector<16xf32> to vector<16x1xf32>
    %cst_27 = arith.constant 3.200000e+01 : f32
    %62 = vector.broadcast %cst_27 : f32 to vector<16x1xf32>
    %63 = arith.divf %61, %62 : vector<16x1xf32>
    %cst_28 = arith.constant 9.99999974E-6 : f32
    %64 = vector.broadcast %cst_28 : f32 to vector<16x1xf32>
    %65 = arith.addf %63, %64 : vector<16x1xf32>
    %66 = math.rsqrt %65 : vector<16x1xf32>
    %67 = vector.broadcast %66 : vector<16x1xf32> to vector<16x32xf32>
    %68 = arith.mulf %58, %67 : vector<16x32xf32>
    %69 = vector.broadcast %51 : vector<1x32xf32> to vector<16x32xf32>
    %70 = arith.mulf %68, %69 : vector<16x32xf32>
    %71 = vector.broadcast %52 : vector<1x32xf32> to vector<16x32xf32>
    %72 = arith.addf %70, %71 : vector<16x32xf32>
    %c0_29 = arith.constant 0 : index
    %c0_30 = arith.constant 0 : index
    %73 = vector.load %arg9[%c0_29, %c0_30] : memref<32x64xf32, #tpu.memory_space<vmem>>, vector<32x64xf32>
    %cst_31 = arith.constant dense<0.000000e+00> : vector<16x64xf32>
    %74 = tpu.matmul %72, %73, %cst_31 {dimension_numbers = #tpu.dot_dimension_numbers<[1], [0], [0], [1], [0, 0, 1, 1], [], []>} : vector<16x32xf32>, vector<32x64xf32>, vector<16x64xf32> -> vector<16x64xf32>
    %c0_32 = arith.constant 0 : index
    %c0_33 = arith.constant 0 : index
    %75 = vector.load %arg10[%c0_32, %c0_33] : memref<1x64xf32, #tpu.memory_space<vmem>>, vector<1x64xf32>
    %76 = vector.broadcast %75 : vector<1x64xf32> to vector<16x64xf32>
    %77 = arith.addf %74, %76 : vector<16x64xf32>
    %cst_34 = arith.constant 0.000000e+00 : f32
    %78 = vector.broadcast %cst_34 : f32 to vector<16x64xf32>
    %79 = arith.maximumf %77, %78 : vector<16x64xf32>
    %c0_35 = arith.constant 0 : index
    %c0_36 = arith.constant 0 : index
    %80 = vector.load %arg11[%c0_35, %c0_36] : memref<64x32xf32, #tpu.memory_space<vmem>>, vector<64x32xf32>
    %cst_37 = arith.constant dense<0.000000e+00> : vector<16x32xf32>
    %81 = tpu.matmul %79, %80, %cst_37 {dimension_numbers = #tpu.dot_dimension_numbers<[1], [0], [0], [1], [0, 0, 1, 1], [], []>} : vector<16x64xf32>, vector<64x32xf32>, vector<16x32xf32> -> vector<16x32xf32>
    %c0_38 = arith.constant 0 : index
    %c0_39 = arith.constant 0 : index
    %82 = vector.load %arg12[%c0_38, %c0_39] : memref<1x32xf32, #tpu.memory_space<vmem>>, vector<1x32xf32>
    %83 = vector.broadcast %82 : vector<1x32xf32> to vector<16x32xf32>
    %84 = arith.addf %81, %83 : vector<16x32xf32>
    %85 = arith.addf %72, %84 : vector<16x32xf32>
    %c0_40 = arith.constant 0 : index
    %c0_41 = arith.constant 0 : index
    %86 = vector.load %arg13[%c0_40, %c0_41] : memref<1x32xf32, #tpu.memory_space<vmem>>, vector<1x32xf32>
    %c0_42 = arith.constant 0 : index
    %c0_43 = arith.constant 0 : index
    %87 = vector.load %arg14[%c0_42, %c0_43] : memref<1x32xf32, #tpu.memory_space<vmem>>, vector<1x32xf32>
    %cst_44 = arith.constant dense<0.000000e+00> : vector<16xf32>
    %88 = vector.multi_reduction <add>, %85, %cst_44 [1] : vector<16x32xf32> to vector<16xf32>
    %89 = vector.shape_cast %88 : vector<16xf32> to vector<16x1xf32>
    %cst_45 = arith.constant 3.200000e+01 : f32
    %90 = vector.broadcast %cst_45 : f32 to vector<16x1xf32>
    %91 = arith.divf %89, %90 : vector<16x1xf32>
    %92 = vector.broadcast %91 : vector<16x1xf32> to vector<16x32xf32>
    %93 = arith.subf %85, %92 : vector<16x32xf32>
    %94 = arith.mulf %93, %93 : vector<16x32xf32>
    %cst_46 = arith.constant dense<0.000000e+00> : vector<16xf32>
    %95 = vector.multi_reduction <add>, %94, %cst_46 [1] : vector<16x32xf32> to vector<16xf32>
    %96 = vector.shape_cast %95 : vector<16xf32> to vector<16x1xf32>
    %cst_47 = arith.constant 3.200000e+01 : f32
    %97 = vector.broadcast %cst_47 : f32 to vector<16x1xf32>
    %98 = arith.divf %96, %97 : vector<16x1xf32>
    %cst_48 = arith.constant 9.99999974E-6 : f32
    %99 = vector.broadcast %cst_48 : f32 to vector<16x1xf32>
    %100 = arith.addf %98, %99 : vector<16x1xf32>
    %101 = math.rsqrt %100 : vector<16x1xf32>
    %102 = vector.broadcast %101 : vector<16x1xf32> to vector<16x32xf32>
    %103 = arith.mulf %93, %102 : vector<16x32xf32>
    %104 = vector.broadcast %86 : vector<1x32xf32> to vector<16x32xf32>
    %105 = arith.mulf %103, %104 : vector<16x32xf32>
    %106 = vector.broadcast %87 : vector<1x32xf32> to vector<16x32xf32>
    %107 = arith.addf %105, %106 : vector<16x32xf32>
    %108 = vector.shape_cast %107 : vector<16x32xf32> to vector<2x8x32xf32>
    %c0_49 = arith.constant 0 : index
    %c0_50 = arith.constant 0 : index
    %c0_51 = arith.constant 0 : index
    %109 = vector.load %arg15[%c0_49, %c0_50, %c0_51] : memref<2x8x32xf32, #tpu.memory_space<vmem>>, vector<2x8x32xf32>
    tpu.vector_store %arg15[%c0_49, %c0_50, %c0_51], %108 {strides = array<i32>} : memref<2x8x32xf32, #tpu.memory_space<vmem>>, vector<2x8x32xf32>,
    return
  }
  func.func @transform_0(%arg0: i32) -> (i32, i32, i32, i32) {
    %c0_i32 = arith.constant 0 : i32
    %c0_i32_0 = arith.constant 0 : i32
    %c0_i32_1 = arith.constant 0 : i32
    %c0_i32_2 = arith.constant 0 : i32
    return %arg0, %c0_i32, %c0_i32_0, %c0_i32_1 : i32, i32, i32, i32
  }
  func.func @transform_1(%arg0: i32) -> (i32, i32, i32) {
    %c0_i32 = arith.constant 0 : i32
    %c0_i32_0 = arith.constant 0 : i32
    %c0_i32_1 = arith.constant 0 : i32
    return %arg0, %c0_i32, %c0_i32_0 : i32, i32, i32
  }
  func.func @transform_2(%arg0: i32) -> (i32, i32) {
    %c0_i32 = arith.constant 0 : i32
    %c0_i32_0 = arith.constant 0 : i32
    %c0_i32_1 = arith.constant 0 : i32
    return %c0_i32, %c0_i32_0 : i32, i32
  }
  func.func @transform_3(%arg0: i32) -> (i32, i32) {
    %c0_i32 = arith.constant 0 : i32
    %c0_i32_0 = arith.constant 0 : i32
    %c0_i32_1 = arith.constant 0 : i32
    return %c0_i32, %c0_i32_0 : i32, i32
  }
  func.func @transform_4(%arg0: i32) -> (i32, i32) {
    %c0_i32 = arith.constant 0 : i32
    %c0_i32_0 = arith.constant 0 : i32
    %c0_i32_1 = arith.constant 0 : i32
    return %c0_i32, %c0_i32_0 : i32, i32
  }
  func.func @transform_5(%arg0: i32) -> (i32, i32) {
    %c0_i32 = arith.constant 0 : i32
    %c0_i32_0 = arith.constant 0 : i32
    %c0_i32_1 = arith.constant 0 : i32
    return %c0_i32, %c0_i32_0 : i32, i32
  }
  func.func @transform_6(%arg0: i32) -> (i32, i32) {
    %c0_i32 = arith.constant 0 : i32
    %c0_i32_0 = arith.constant 0 : i32
    %c0_i32_1 = arith.constant 0 : i32
    return %c0_i32, %c0_i32_0 : i32, i32
  }
  func.func @transform_7(%arg0: i32) -> (i32, i32) {
    %c0_i32 = arith.constant 0 : i32
    %c0_i32_0 = arith.constant 0 : i32
    %c0_i32_1 = arith.constant 0 : i32
    return %c0_i32, %c0_i32_0 : i32, i32
  }
  func.func @transform_8(%arg0: i32) -> (i32, i32) {
    %c0_i32 = arith.constant 0 : i32
    %c0_i32_0 = arith.constant 0 : i32
    %c0_i32_1 = arith.constant 0 : i32
    return %c0_i32, %c0_i32_0 : i32, i32
  }
  func.func @transform_9(%arg0: i32) -> (i32, i32) {
    %c0_i32 = arith.constant 0 : i32
    %c0_i32_0 = arith.constant 0 : i32
    %c0_i32_1 = arith.constant 0 : i32
    return %c0_i32, %c0_i32_0 : i32, i32
  }
  func.func @transform_10(%arg0: i32) -> (i32, i32) {
    %c0_i32 = arith.constant 0 : i32
    %c0_i32_0 = arith.constant 0 : i32
    %c0_i32_1 = arith.constant 0 : i32
    return %c0_i32, %c0_i32_0 : i32, i32
  }
  func.func @transform_11(%arg0: i32) -> (i32, i32) {
    %c0_i32 = arith.constant 0 : i32
    %c0_i32_0 = arith.constant 0 : i32
    %c0_i32_1 = arith.constant 0 : i32
    return %c0_i32, %c0_i32_0 : i32, i32
  }
  func.func @transform_12(%arg0: i32) -> (i32, i32) {
    %c0_i32 = arith.constant 0 : i32
    %c0_i32_0 = arith.constant 0 : i32
    %c0_i32_1 = arith.constant 0 : i32
    return %c0_i32, %c0_i32_0 : i32, i32
  }
  func.func @transform_13(%arg0: i32) -> (i32, i32) {
    %c0_i32 = arith.constant 0 : i32
    %c0_i32_0 = arith.constant 0 : i32
    %c0_i32_1 = arith.constant 0 : i32
    return %c0_i32, %c0_i32_0 : i32, i32
  }
  func.func @transform_14(%arg0: i32) -> (i32, i32, i32) {
    %c0_i32 = arith.constant 0 : i32
    %c0_i32_0 = arith.constant 0 : i32
    %c0_i32_1 = arith.constant 0 : i32
    return %arg0, %c0_i32, %c0_i32_0 : i32, i32, i32
  }
}

</mosaic_0001>

<bundles_post_ra>
// kernel: tpu_custom_call.1
= control target key start
LH: loop header
LB: loop body
LE: loop exit
PB: predicated region body
PF: predicated region fallthrough
CT: control target
= control target key end

     0   :  { %19 = vsyncpa [#allocation3], 0  ;;  %s4060_s0 = inlined_call_operand.vmem [shape: s32[2,1,1,1], index: 0, kind: input, shape index: {}]   ;;  %s4061_s1 = inlined_call_operand.hbm [shape: f32[2,8,32], index: 1, kind: input, shape index: {}]   ;;  %s4062_s2 = inlined_call_operand.vmem [shape: f32[32,96], index: 2, kind: input, shape index: {}]   ;;  %s4063_s3 = inlined_call_operand.vmem [shape: f32[1,96], index: 3, kind: input, shape index: {}]   ;;  %s4064_s4 = inlined_call_operand.vmem [shape: f32[32,32], index: 4, kind: input, shape index: {}]   ;;  %s4065_s5 = inlined_call_operand.vmem [shape: f32[1,32], index: 5, kind: input, shape index: {}]   ;;  %s4066_s6 = inlined_call_operand.vmem [shape: f32[1,32], index: 6, kind: input, shape index: {}]   ;;  %s4067_s7 = inlined_call_operand.vmem [shape: f32[1,32], index: 7, kind: input, shape index: {}]   ;;  %s4068_s8 = inlined_call_operand.vmem [shape: f32[32,64], index: 8, kind: input, shape index: {}]   ;;  %s4069_s9 = inlined_call_operand.vmem [shape: f32[1,64], index: 9, kind: input, shape index: {}]   ;;  %s4070_s10 = inlined_call_operand.vmem [shape: f32[64,32], index: 10, kind: input, shape index: {}]   ;;  %s4071_s11 = inlined_call_operand.vmem [shape: f32[1,32], index: 11, kind: input, shape index: {}]   ;;  %s4072_s12 = inlined_call_operand.vmem [shape: f32[1,32], index: 12, kind: input, shape index: {}]   ;;  %s4073_s13 = inlined_call_operand.vmem [shape: f32[1,32], index: 13, kind: input, shape index: {}]   ;;  %s4074_s14 = inlined_call_operand.hbm [shape: f32[2,8,32], index: 14, kind: output, shape index: {}]  }
   0x1   :  { %20 = vsyncpa [#allocation4], 0  ;;  %s3449_s29 = smov [#allocation2]   ;;  %s3401_s17 = scalar_lea.hbm %s4061_s1, 256 }
   0x2   :  { %s28_s30 = sshll.u32 %s3449_s29, 4  ;;  %p3402_p0 = scmp.ne.s32.totalorder %s4061_s1, %s3401_s17  ;;  %s29_s30 = int_to_ptr.vmem [resolvable:$true] %s28_s30 }
   0x3   :  { %p3405_p1 = scmp.lt.u32.totalorder %s3401_s17, %s4061_s1 }
   0x5   :  { %p3407_p2 = pnand %p3405_p1, %p3402_p0 }
   0x7   :  { %3410 = shalt.err (!%p3407_p2)
}
   0x8   :  { %s3411_s22 = scalar_lea.vmem %s29_s30, 256  ;;  %p3416_p4 = scmp.lt.s32.totalorder %s29_s30, %s29_s30 }
   0x9   :  { %p3412_p3 = scmp.ne.s32.totalorder %s29_s30, %s3411_s22  ;;  %p3417_p5 = scmp.lt.s32.totalorder %s3411_s22, %s3411_s22 }
   0xb   :  { %p3418_p6 = por %p3417_p5, %p3416_p4 }
   0xd   :  { %p3419_p7 = pnand %p3418_p6, %p3412_p3 }
   0xf   :  { %3422 = shalt.err (!%p3419_p7)
}
  0x10   :  { %s3450_s23 = smov 128   ;;  %s3451_s24 = smov 8  }
  0x11   :  { %34 = dma.hbm_to_vmem [thread:$0]  %s4061_s1, 256, %s29_s30, [#allocation3], %s3450_s23, %s3450_s23, %s3451_s24  }
  0x12   :  { %3445 = dma.done.wait [#allocation3], 256  }
  0x13   :  { %3446 = vsyncadd [#allocation3], 4294967040  ;;  %vm75_vm0 = vcmask 261120   ;;  %v64_v0 = vld [vmem:[%s4062_s2] sm:$0xff]  ;;  %v65_v1 = vld [vmem:[%s4062_s2 + $0x8] sm:$0xff]  ;;  %s3453_s20 = smov 120   ;;  %v182_v16 = vlaneseq }
  0x14   :  { %v66_v2 = vld [vmem:[%s4062_s2 + $0x10] sm:$0xff]  ;;  %v3301_v3 = vpack.c.bf16 %v65_v1, %v64_v0  ;;  %v67_v4 = vld [vmem:[%s4062_s2 + $0x18] sm:$0xff]  ;;  %v62_v5 = vld [vmem:[#allocation2] sm:$0xff]  ;;  %s3452_s2 = smov 104   ;;  %v3454_v13 = vmov 0   ;;  %s3455_s21 = smov 112  }
  0x15   :  { %v3305_v6 = vpack.c.bf16 %v67_v4, %v66_v2  ;;  %3177 = vmatprep.mubr.msk.f32.mxu1 %vm75_vm0, %v62_v5  ;;  %v63_v7 = vld [vmem:[#allocation2 + $0x8] sm:$0xff]  ;;  %v3053_v8 = vld [vmem:[%s4063_s3] ss:$0 sm:$0xff]  ;;  %3358 = vset.pattern.permute.xlu1 %v3454_v13  ;;  %s3456_s3 = smov 96   ;;  %v3457_v14 = vmov 1983009808  }
  0x16   :  { %3302 = vmatprep.subr.bf16.mxu1 %v3301_v3  ;;  %3357 = vset.pattern.permute.xlu0 %v3454_v13  ;;  %v180_v15 = vunpack.c.l.s4 %v3457_v14  ;;  %v3458_v17 = vmov 1934713408   ;;  %v3585_v20 = vshrl.u32 %v182_v16, 7  ;;  %v1653_v50 = vld [vmem:[%s4060_s0 + $0x1] sm:$0x1]  ;;  %v3459_v57 = vmov 0.0  }
  0x17   :  { %3304 = vmatpush3.bf16.msra.mxu1 %v3301_v3  ;;  %v212_v18 = vunpack.c.l.s4 %v3458_v17  ;;  %v1652_v55 = vld [vmem:[%s4060_s0] sm:$0x1]  ;;  %3190 = vmatprep.subr.mxu0 %v3459_v57  ;;  %vm3460_vm1 = vmmov 0   ;;  %s3461_s28 = smov 64   ;;  %vm1041_vm2 = vcmask 64512   ;;  %s3462_s0 = smov 16  }
  0x18   :  { %3306 = vmatprep.subr.bf16.mxu1 %v3305_v6  ;;  %v181_v19 = vunpack.c.0.s8 %v180_v15  ;;  %3192 = vmatprep.mubr.msk.f32.mxu0 %vm3460_vm1, %v3459_v57  ;;  %s3463_s18 = smov 24   ;;  %vm2652_vm5 = vcmask 130048   ;;  %vm2655_vm6 = vcmask 195584   ;;  %vm2906_vm7 = vcmask 523264   ;;  %s3464_s15 = smov [#allocation5]  }
  0x19   :  { %v213_v25 = vunpack.c.0.s8 %v212_v18  ;;  %s3041_s16 = sshll.u32 %s3464_s15, 4  ;;  %s3042_s16 = int_to_ptr.vmem [resolvable:$true] %s3041_s16 }
  0x1a   :  { %v3593_v26 = vsub.s32 %v181_v19, %v3585_v20  ;;  %s3423_s17 = scalar_lea.vmem %s3042_s16, 256  ;;  %p3428_p9 = scmp.lt.s32.totalorder %s3042_s16, %s3042_s16 }
  0x1b   :  { %3308 = vmatpush3.bf16.msra.mxu1 %v3305_v6  ;;  %v3603_v31 = vsub.s32 %v213_v25, %v3585_v20  ;;  %p3424_p8 = scmp.ne.s32.totalorder %s3042_s16, %s3423_s17  ;;  %p3429_p10 = scmp.lt.s32.totalorder %s3423_s17, %s3423_s17 }
  0x1c   :  { %3180 = vmatprep.subr.mxu1 %v3459_v57 }
  0x1d   :  { %p3430_p11 = por %p3429_p10, %p3428_p9 }
  0x1e   :  { %3178 = vmatmul.mubr.msk.f32.vlgmr.msra.gmra.mrb[0].mxu1 %vm75_vm0, %v63_v7 }
  0x1f   :  { %3182 = vmatprep.mubr.msk.f32.mxu1 %vm3460_vm1, %v3459_v57  ;;  %p3431_p12 = pnand %p3430_p11, %p3424_p8 }
  0xf1   :  { %v3179_v9 = vpop.f32.mrb[0].mxu1 }
  0xf2   :  { %v148_v10 = vpop.f32.mrb[1].mxu1  ;;  %v3576_v12 = vadd.f32 %v3179_v9, %v3053_v8 }
  0xf3   :  { %v3572_v11 = vadd.f32 %v3053_v8, %v148_v10 }
  0xf5   :  { %171 = vrot.lane.b32.xlu1 %v3572_v11, %s3452_s2  ;;  %159 = vrot.lane.b32.xlu0 %v3572_v11, %s3453_s20 }
  0xf9   :  { %161 = vrot.lane.b32.xlu1 %v3576_v12, %s3453_s20  ;;  %165 = vrot.lane.b32.xlu0 %v3572_v11, %s3455_s21 }
  0xfd   :  { %173 = vrot.lane.b32.xlu1 %v3576_v12, %s3452_s2  ;;  %167 = vrot.lane.b32.xlu0 %v3576_v12, %s3455_s21 }
 0x101   :  { %449 = vrot.lane.b32.xlu0 %v3572_v11, %s3456_s3 }
 0x167   :  { %v3587_v21 = vpop.permute.xlu1 %171  ;;  %v160_v22 = vpop.permute.xlu0 %159 }
 0x168   :  { %v193_v23 = vcombine.low %v160_v22, %v3587_v21  ;;  %v194_v24 = vcombine.high %v160_v22, %v3587_v21  ;;  %453 = vrot.lane.b32.xlu1 %v160_v22, %s3456_s3 }
 0x16a   :  { %v201_v32 = vrot.slane %v193_v23, %v3593_v26  ;;  %v208_v33 = vrot.slane %v194_v24, %v3593_v26 }
 0x16b   :  { %v166_v27 = vpop.permute.xlu0 %165  ;;  %v3600_v30 = vpop.permute.xlu1 %161 }
 0x16c   :  { %v177_v28 = vcombine.low %v3572_v11, %v166_v27  ;;  %v178_v29 = vcombine.high %v3572_v11, %v166_v27  ;;  %461 = vrot.lane.b32.xlu1 %v3587_v21, %s3456_s3  ;;  %457 = vrot.lane.b32.xlu0 %v166_v27, %s3456_s3 }
 0x16e   :  { %v185_v34 = vrot.slane %v177_v28, %v3593_v26  ;;  %v192_v35 = vrot.slane %v178_v29, %v3593_v26 }
 0x16f   :  { %v3617_v44 = vpop.permute.xlu1 %173  ;;  %v3619_v49 = vpop.permute.xlu0 %167 }
 0x170   :  { %v209_v36 = vcombine.low %v185_v34, %v201_v32  ;;  %v210_v37 = vcombine.high %v185_v34, %v201_v32  ;;  %v225_v38 = vcombine.low %v192_v35, %v208_v33  ;;  %v226_v39 = vcombine.high %v192_v35, %v208_v33  ;;  %455 = vrot.lane.b32.xlu1 %v3600_v30, %s3456_s3 }
 0x171   :  { %451 = vrot.lane.b32.xlu0 %v3576_v12, %s3456_s3  ;;  %v261_v5 = vcombine.low %v3600_v30, %v3617_v44  ;;  %v245_v6 = vcombine.low %v3576_v12, %v3619_v49  ;;  %v262_v7 = vcombine.high %v3600_v30, %v3617_v44  ;;  %v246_v9 = vcombine.high %v3576_v12, %v3619_v49 }
 0x172   :  { %v217_v40 = vrot.slane %v209_v36, %v3603_v31  ;;  %v224_v41 = vrot.slane %v210_v37, %v3603_v31  ;;  %v233_v42 = vrot.slane %v225_v38, %v3603_v31  ;;  %v240_v43 = vrot.slane %v226_v39, %v3603_v31 }
 0x173   :  { %v269_v8 = vrot.slane %v261_v5, %v3593_v26  ;;  %v253_v10 = vrot.slane %v245_v6, %v3593_v26  ;;  %v260_v13 = vrot.slane %v246_v9, %v3593_v26  ;;  %v450_v17 = vpop.permute.xlu0 %449 }
 0x174   :  { %v313_v45 = vcombine.low %v217_v40, %v224_v41  ;;  %v3056_v46 = vcombine.high %v217_v40, %v224_v41  ;;  %v329_v47 = vcombine.low %v233_v42, %v240_v43  ;;  %v3057_v48 = vcombine.high %v233_v42, %v240_v43  ;;  %463 = vrot.lane.b32.xlu1 %v3617_v44, %s3456_s3 }
 0x175   :  { %459 = vrot.lane.b32.xlu0 %v3619_v49, %s3456_s3  ;;  %v277_v14 = vcombine.low %v253_v10, %v269_v8  ;;  %v278_v15 = vcombine.high %v253_v10, %v269_v8 }
 0x176   :  { %v320_v51 = vrot.slane %v313_v45, %v3593_v26  ;;  %v328_v52 = vrot.slane %v3056_v46, %v3593_v26  ;;  %v336_v53 = vrot.slane %v329_v47, %v3593_v26  ;;  %v344_v54 = vrot.slane %v3057_v48, %v3593_v26 }
 0x177   :  { %v285_v19 = vrot.slane %v277_v14, %v3603_v31 }
 0x178   :  { %1662 = vperm.xlu1 %3358, %v1653_v50   ;;  %v345_v56 = vcombine.low %v320_v51, %v328_v52  ;;  %v361_v59 = vcombine.low %v336_v53, %v344_v54  ;;  %v346_v60 = vcombine.high %v320_v51, %v328_v52  ;;  %v362_v63 = vcombine.high %v336_v53, %v344_v54 }
 0x179   :  { %1655 = vperm.xlu0 %3357, %v1652_v55  }
 0x17a   :  { %v3638_v58 = vrot.slane %v345_v56, %v3603_v31  ;;  %v3646_v61 = vrot.slane %v361_v59, %v3603_v31  ;;  %v3649_v62 = vrot.slane %v346_v60, %v3603_v31  ;;  %v3656_v1 = vrot.slane %v362_v63, %v3603_v31 }
 0x17c   :  { %749 = vrot.lane.b32.xlu1 %v160_v22, %s3461_s28  ;;  %v377_v0 = vcombine.low %v3638_v58, %v3646_v61  ;;  %v378_v2 = vcombine.high %v3638_v58, %v3646_v61  ;;  %v379_v3 = vcombine.low %v3649_v62, %v3656_v1  ;;  %v380_v4 = vcombine.high %v3649_v62, %v3656_v1 }
 0x17d   :  { %745 = vrot.lane.b32.xlu0 %v3572_v11, %s3461_s28  ;;  %v276_v11 = vrot.slane %v262_v7, %v3593_v26 }
 0x17f   :  { %v293_v22 = vcombine.low %v260_v13, %v276_v11  ;;  %v294_v23 = vcombine.high %v260_v13, %v276_v11 }
 0x180   :  { %753 = vrot.lane.b32.xlu1 %v166_v27, %s3461_s28 }
 0x181   :  { %757 = vrot.lane.b32.xlu0 %v3587_v21, %s3461_s28  ;;  %v292_v21 = vrot.slane %v278_v15, %v3603_v31  ;;  %v301_v37 = vrot.slane %v293_v22, %v3603_v31  ;;  %v308_v38 = vrot.slane %v294_v23, %v3603_v31 }
 0x183   :  { %v381_v39 = vcombine.low %v285_v19, %v292_v21  ;;  %v3058_v40 = vcombine.high %v285_v19, %v292_v21  ;;  %v397_v55 = vcombine.low %v301_v37, %v308_v38  ;;  %v3059_v56 = vcombine.high %v301_v37, %v308_v38 }
 0x185   :  { %v3692_v53 = vrot.slane %v381_v39, %v3593_v26  ;;  %v3695_v54 = vrot.slane %v3058_v40, %v3593_v26 }
 0x1da   :  { %v454_v18 = vpop.permute.xlu1 %453 }
 0x1de   :  { %v462_v24 = vpop.permute.xlu1 %461  ;;  %v458_v25 = vpop.permute.xlu0 %457 }
 0x1df   :  { %v489_v27 = vcombine.low %v454_v18, %v462_v24  ;;  %v490_v28 = vcombine.high %v454_v18, %v462_v24  ;;  %v473_v29 = vcombine.low %v450_v17, %v458_v25  ;;  %v474_v32 = vcombine.high %v450_v17, %v458_v25 }
 0x1e1   :  { %v497_v33 = vrot.slane %v489_v27, %v3593_v26  ;;  %v504_v34 = vrot.slane %v490_v28, %v3593_v26  ;;  %v481_v35 = vrot.slane %v473_v29, %v3593_v26  ;;  %v488_v36 = vrot.slane %v474_v32, %v3593_v26 }
 0x1e2   :  { %v456_v41 = vpop.permute.xlu1 %455 }
 0x1e3   :  { %v505_v42 = vcombine.low %v481_v35, %v497_v33  ;;  %v506_v43 = vcombine.high %v481_v35, %v497_v33  ;;  %v521_v45 = vcombine.low %v488_v36, %v504_v34  ;;  %v522_v46 = vcombine.high %v488_v36, %v504_v34  ;;  %v452_v47 = vpop.permute.xlu0 %451 }
 0x1e5   :  { %v513_v48 = vrot.slane %v505_v42, %v3603_v31  ;;  %v520_v50 = vrot.slane %v506_v43, %v3603_v31  ;;  %v529_v51 = vrot.slane %v521_v45, %v3603_v31  ;;  %v536_v52 = vrot.slane %v522_v46, %v3603_v31 }
 0x1e6   :  { %v464_v59 = vpop.permute.xlu1 %463  ;;  %v404_v42 = vrot.slane %v397_v55, %v3593_v26  ;;  %v412_v43 = vrot.slane %v3059_v56, %v3593_v26 }
 0x1e7   :  { %v609_v60 = vcombine.low %v513_v48, %v520_v50  ;;  %v3060_v63 = vcombine.high %v513_v48, %v520_v50  ;;  %v625_v5 = vcombine.low %v529_v51, %v536_v52  ;;  %v3061_v6 = vcombine.high %v529_v51, %v536_v52  ;;  %v460_v7 = vpop.permute.xlu0 %459 }
 0x1e8   :  { %v557_v8 = vcombine.low %v456_v41, %v464_v59  ;;  %v558_v9 = vcombine.high %v456_v41, %v464_v59  ;;  %v541_v10 = vcombine.low %v452_v47, %v460_v7  ;;  %v542_v11 = vcombine.high %v452_v47, %v460_v7 }
 0x1e9   :  { %v616_v13 = vrot.slane %v609_v60, %v3593_v26  ;;  %v624_v14 = vrot.slane %v3060_v63, %v3593_v26  ;;  %v632_v15 = vrot.slane %v625_v5, %v3593_v26  ;;  %v640_v17 = vrot.slane %v3061_v6, %v3593_v26 }
 0x1ea   :  { %v565_v18 = vrot.slane %v557_v8, %v3593_v26  ;;  %v572_v19 = vrot.slane %v558_v9, %v3593_v26  ;;  %v549_v21 = vrot.slane %v541_v10, %v3593_v26  ;;  %v556_v22 = vrot.slane %v542_v11, %v3593_v26 }
 0x1eb   :  { %v641_v23 = vcombine.low %v616_v13, %v624_v14  ;;  %v657_v24 = vcombine.low %v632_v15, %v640_v17  ;;  %v642_v25 = vcombine.high %v616_v13, %v624_v14  ;;  %v658_v27 = vcombine.high %v632_v15, %v640_v17 }
 0x1ec   :  { %v573_v28 = vcombine.low %v549_v21, %v565_v18  ;;  %v574_v29 = vcombine.high %v549_v21, %v565_v18  ;;  %v589_v32 = vcombine.low %v556_v22, %v572_v19  ;;  %v590_v33 = vcombine.high %v556_v22, %v572_v19 }
 0x1ed   :  { %v649_v34 = vrot.slane %v641_v23, %v3603_v31  ;;  %v665_v35 = vrot.slane %v657_v24, %v3603_v31  ;;  %v656_v36 = vrot.slane %v642_v25, %v3603_v31  ;;  %v672_v37 = vrot.slane %v658_v27, %v3603_v31 }
 0x1ee   :  { %v581_v38 = vrot.slane %v573_v28, %v3603_v31  ;;  %v588_v39 = vrot.slane %v574_v29, %v3603_v31  ;;  %v597_v40 = vrot.slane %v589_v32, %v3603_v31  ;;  %v604_v41 = vrot.slane %v590_v33, %v3603_v31 }
 0x1ef   :  { %v673_v45 = vcombine.low %v649_v34, %v665_v35  ;;  %v675_v46 = vcombine.low %v656_v36, %v672_v37  ;;  %v674_v56 = vcombine.high %v649_v34, %v665_v35  ;;  %v413_v63 = vcombine.low %v3692_v53, %v3695_v54 }
 0x1f0   :  { %v677_v47 = vcombine.low %v581_v38, %v588_v39  ;;  %v3062_v48 = vcombine.high %v581_v38, %v588_v39  ;;  %v693_v50 = vcombine.low %v597_v40, %v604_v41  ;;  %v3063_v51 = vcombine.high %v597_v40, %v604_v41 }
 0x1f1   :  { %3181 = vmatpush3.xpose.msk.msra.mxu1 %vm1041_vm2, %v673_v45  ;;  %3191 = vmatpush3.xpose.msk.msra.mxu0 %vm1041_vm2, %v675_v46  ;;  %v429_v5 = vcombine.low %v404_v42, %v412_v43  ;;  %v414_v13 = vcombine.high %v3692_v53, %v3695_v54  ;;  %v430_v17 = vcombine.high %v404_v42, %v412_v43 }
 0x1f2   :  { %v684_v52 = vrot.slane %v677_v47, %v3593_v26  ;;  %v692_v59 = vrot.slane %v3062_v48, %v3593_v26  ;;  %v700_v60 = vrot.slane %v693_v50, %v3593_v26  ;;  %v708_v55 = vrot.slane %v3063_v51, %v3593_v26  ;;  %3185 = vmatprep.subr.mxu1 %v3459_v57 }
 0x1f3   :  { %3200 = vmatprep.subr.mxu0 %v3459_v57  ;;  %v437_v15 = vrot.slane %v429_v5, %v3603_v31  ;;  %v428_v61 = vrot.slane %v414_v13, %v3603_v31 }
 0x1f4   :  { %v709_v6 = vcombine.low %v684_v52, %v692_v59  ;;  %v710_v7 = vcombine.high %v684_v52, %v692_v59  ;;  %v725_v8 = vcombine.low %v700_v60, %v708_v55  ;;  %v726_v9 = vcombine.high %v700_v60, %v708_v55  ;;  %3183 = vmatmul.mubr.msk.f32.vlgmr.msra.gmra.mrb[2].mxu1 %vm1041_vm2, %v377_v0 }
 0x1f5   :  { %3193 = vmatmul.mubr.msk.f32.vlgmr.msra.gmra.mrb[0].mxu0 %vm1041_vm2, %v379_v3  ;;  %3186 = vmatpush3.xpose.msk.msra.mxu1 %vm1041_vm2, %v674_v56  ;;  %v676_v0 = vcombine.high %v656_v36, %v672_v37  ;;  %v421_v3 = vrot.slane %v413_v63, %v3603_v31 }
 0x1f6   :  { %3187 = vmatprep.mubr.msk.f32.mxu1 %vm3460_vm1, %v3459_v57  ;;  %3195 = vmatprep.subr.mxu1 %v3459_v57  ;;  %v717_v10 = vrot.slane %v709_v6, %v3603_v31  ;;  %v733_v11 = vrot.slane %v725_v8, %v3603_v31  ;;  %v724_v53 = vrot.slane %v710_v7, %v3603_v31 }
 0x1f7   :  { %v3741_v14 = vpop.permute.xlu1 %1662  ;;  %3202 = vmatprep.mubr.msk.f32.mxu0 %vm3460_vm1, %v3459_v57  ;;  %v740_v54 = vrot.slane %v726_v9, %v3603_v31  ;;  %v445_v22 = vcombine.low %v421_v3, %v437_v15  ;;  %v446_v25 = vcombine.high %v421_v3, %v437_v15 }
 0x1f8   :  { %v3747_v18 = vpop.permute.xlu0 %1655  ;;  %3188 = vmatmul.mubr.msk.f32.vlgmr.msra.gmra.mrb[4].mxu1 %vm1041_vm2, %v378_v2  ;;  %v741_v19 = vcombine.low %v717_v10, %v733_v11  ;;  %v742_v58 = vcombine.high %v717_v10, %v733_v11  ;;  %v444_v2 = vrot.slane %v430_v17, %v3603_v31  ;;  %v1659_v17 = vsub.s32 0, %v3585_v20 }
 0x1f9   :  { %3196 = vmatpush3.xpose.msk.msra.mxu1 %vm1041_vm2, %v676_v0  ;;  %3197 = vmatprep.mubr.msk.f32.mxu1 %vm3460_vm1, %v3459_v57  ;;  %v743_v24 = vcombine.low %v724_v53, %v740_v54  ;;  %v744_v62 = vcombine.high %v724_v53, %v740_v54 }
 0x1fa   :  { %3201 = vmatpush3.xpose.msk.msra.mxu0 %vm1041_vm2, %v741_v19  ;;  %3205 = vmatprep.subr.mxu1 %v3459_v57  ;;  %v447_v28 = vcombine.low %v428_v61, %v444_v2  ;;  %v448_v36 = vcombine.high %v428_v61, %v444_v2  ;;  %v1651_v19 = vand.u32 127, %v182_v16  ;;  %v1660_v53 = vrot.slane %v3747_v18, %v1659_v17 }
 0x1fb   :  { %v750_v21 = vpop.permute.xlu1 %749  ;;  %3210 = vmatprep.subr.mxu0 %v3459_v57 }
 0x1fc   :  { %v746_v23 = vpop.permute.xlu0 %745  ;;  %3198 = vmatmul.mubr.msk.f32.vlgmr.msra.gmra.mrb[6].mxu1 %vm1041_vm2, %v380_v4  ;;  %vm1668_vm3 = vcmp.lt.s32.totalorder %v1651_v19, %v1660_v53 }
 0x1fd   :  { %3203 = vmatmul.mubr.msk.f32.vlgmr.msra.gmra.mrb[2].mxu0 %vm1041_vm2, %v445_v22  ;;  %3206 = vmatpush3.xpose.msk.msra.mxu1 %vm1041_vm2, %v742_v58 }
 0x1fe   :  { %3211 = vmatpush3.xpose.msk.msra.mxu0 %vm1041_vm2, %v743_v24  ;;  %3207 = vmatprep.mubr.msk.f32.mxu1 %vm3460_vm1, %v3459_v57  ;;  %v1667_v24 = vrot.slane %v3741_v14, %v1659_v17 }
 0x1ff   :  { %v754_v27 = vpop.permute.xlu1 %753  ;;  %3212 = vmatprep.mubr.msk.f32.mxu0 %vm3460_vm1, %v3459_v57  ;;  %3215 = vmatprep.subr.mxu1 %v3459_v57 }
 0x200   :  { %v769_v1 = vcombine.low %v746_v23, %v754_v27  ;;  %v770_v4 = vcombine.high %v746_v23, %v754_v27  ;;  %v758_v29 = vpop.permute.xlu0 %757  ;;  %3208 = vmatmul.mubr.msk.f32.vlgmr.msra.gmra.mrb[8].mxu1 %vm1041_vm2, %v446_v25  ;;  %3220 = vmatprep.subr.mxu0 %v3459_v57  ;;  %vm1669_vm4 = vcmp.lt.s32.totalorder %v1651_v19, %v1667_v24 }
 0x201   :  { %v785_v32 = vcombine.low %v750_v21, %v758_v29  ;;  %v786_v33 = vcombine.high %v750_v21, %v758_v29  ;;  %3213 = vmatmul.mubr.msk.f32.vlgmr.msra.gmra.mrb[4].mxu0 %vm1041_vm2, %v447_v28  ;;  %3216 = vmatpush3.xpose.msk.msra.mxu1 %vm1041_vm2, %v744_v62 }
 0x202   :  { %v777_v34 = vrot.slane %v769_v1, %v3593_v26  ;;  %v784_v35 = vrot.slane %v770_v4, %v3593_v26  ;;  %3217 = vmatprep.mubr.msk.f32.mxu1 %vm3460_vm1, %v3459_v57  ;;  %3225 = vmatprep.subr.mxu1 %v3459_v57 }
 0x203   :  { %v793_v37 = vrot.slane %v785_v32, %v3593_v26  ;;  %v800_v38 = vrot.slane %v786_v33, %v3593_v26  ;;  %3222 = vmatprep.mubr.msk.f32.mxu0 %vm3460_vm1, %v3459_v57 }
 0x204   :  { %3218 = vmatmul.mubr.msk.f32.vlgmr.msra.gmra.mrb[10].mxu1 %vm1041_vm2, %v448_v36 }
 0x205   :  { %v801_v39 = vcombine.low %v777_v34, %v793_v37  ;;  %v802_v40 = vcombine.high %v777_v34, %v793_v37  ;;  %v817_v41 = vcombine.low %v784_v35, %v800_v38  ;;  %v818_v42 = vcombine.high %v784_v35, %v800_v38  ;;  %3227 = vmatprep.mubr.msk.f32.mxu1 %vm3460_vm1, %v3459_v57 }
 0x207   :  { %v809_v43 = vrot.slane %v801_v39, %v3603_v31  ;;  %v816_v45 = vrot.slane %v802_v40, %v3603_v31  ;;  %v825_v46 = vrot.slane %v817_v41, %v3603_v31  ;;  %v832_v47 = vrot.slane %v818_v42, %v3603_v31 }
 0x209   :  { %v905_v48 = vcombine.low %v809_v43, %v816_v45  ;;  %v3064_v50 = vcombine.high %v809_v43, %v816_v45  ;;  %v921_v51 = vcombine.low %v825_v46, %v832_v47  ;;  %v3065_v52 = vcombine.high %v825_v46, %v832_v47 }
 0x20b   :  { %v912_v59 = vrot.slane %v905_v48, %v3593_v26  ;;  %v920_v60 = vrot.slane %v3064_v50, %v3593_v26  ;;  %v928_v55 = vrot.slane %v921_v51, %v3593_v26  ;;  %v936_v56 = vrot.slane %v3065_v52, %v3593_v26 }
 0x20d   :  { %v937_v63 = vcombine.low %v912_v59, %v920_v60  ;;  %v953_v5 = vcombine.low %v928_v55, %v936_v56  ;;  %v938_v6 = vcombine.high %v912_v59, %v920_v60  ;;  %v954_v7 = vcombine.high %v928_v55, %v936_v56 }
 0x20f   :  { %v945_v8 = vrot.slane %v937_v63, %v3603_v31  ;;  %v961_v9 = vrot.slane %v953_v5, %v3603_v31  ;;  %v3802_v10 = vrot.slane %v938_v6, %v3603_v31  ;;  %v3805_v11 = vrot.slane %v954_v7, %v3603_v31 }
 0x211   :  { %v969_v13 = vcombine.low %v945_v8, %v961_v9  ;;  %v970_v0 = vcombine.high %v945_v8, %v961_v9  ;;  %v971_v3 = vcombine.low %v3802_v10, %v3805_v11  ;;  %v972_v15 = vcombine.high %v3802_v10, %v3805_v11 }
 0x213   :  { %3221 = vmatpush3.msra.mxu0 %v969_v13  ;;  %3226 = vmatpush3.msra.mxu1 %v970_v0 }
 0x214   :  { %3230 = vmatprep.subr.mxu0 %v3459_v57  ;;  %3235 = vmatprep.subr.mxu1 %v3459_v57 }
 0x2c7   :  { %v1114_v54 = vpop.f32.mrb[2].mxu1 }
 0x2c8   :  { %v1674_v21 = vsel %vm1668_vm3, %v1114_v54, -1000000.0  ;;  %v1266_v22 = vpop.f32.mrb[0].mxu0  ;;  %v3184_v58 = vpop.f32.mrb[3].mxu1 }
 0x2c9   :  { %v1676_v61 = vsel %vm1668_vm3, %v1266_v22, -1000000.0  ;;  %v3194_v2 = vpop.f32.mrb[1].mxu0  ;;  %v1682_v23 = vsel %vm1041_vm2, %v1674_v21, -inf }
 0x2ca   :  { %v1688_v25 = vsel %vm1041_vm2, %v1676_v61, -inf  ;;  %1683 = vmax.xlane.f32.xlu1 %v1682_v23 }
 0x2cb   :  { %1689 = vmax.xlane.f32.xlu0 %v1688_v25  ;;  %v1190_v16 = vpop.f32.mrb[4].mxu1 }
 0x2cc   :  { %v1675_v20 = vsel %vm1668_vm3, %v1190_v16, -1000000.0  ;;  %v3189_v18 = vpop.f32.mrb[5].mxu1 }
 0x2cd   :  { %v1685_v27 = vsel %vm1041_vm2, %v1675_v20, -inf }
 0x2cf   :  { %1686 = vmax.xlane.f32.xlu0 %v1685_v27  ;;  %v1342_v28 = vpop.f32.mrb[6].mxu1 }
 0x2d0   :  { %v1677_v62 = vsel %vm1668_vm3, %v1342_v28, -1000000.0  ;;  %v1418_v1 = vpop.f32.mrb[2].mxu0  ;;  %v3199_v4 = vpop.f32.mrb[7].mxu1 }
 0x2d1   :  { %v1678_v29 = vsel %vm1669_vm4, %v1418_v1, -1000000.0  ;;  %v3204_v14 = vpop.f32.mrb[3].mxu0  ;;  %v1691_v32 = vsel %vm1041_vm2, %v1677_v62, -inf }
 0x2d2   :  { %v1694_v33 = vsel %vm1041_vm2, %v1678_v29, -inf  ;;  %1692 = vmax.xlane.f32.xlu1 %v1691_v32 }
 0x2d3   :  { %1695 = vmax.xlane.f32.xlu0 %v1694_v33  ;;  %v1494_v34 = vpop.f32.mrb[8].mxu1 }
 0x2d4   :  { %v1679_v35 = vsel %vm1669_vm4, %v1494_v34, -1000000.0  ;;  %v1570_v36 = vpop.f32.mrb[4].mxu0  ;;  %v3209_v37 = vpop.f32.mrb[9].mxu1 }
 0x2d5   :  { %v1680_v38 = vsel %vm1669_vm4, %v1570_v36, -1000000.0  ;;  %v3214_v39 = vpop.f32.mrb[5].mxu0  ;;  %v1697_v40 = vsel %vm1041_vm2, %v1679_v35, -inf }
 0x2d6   :  { %v1700_v41 = vsel %vm1041_vm2, %v1680_v38, -inf  ;;  %1698 = vmax.xlane.f32.xlu1 %v1697_v40 }
 0x2d7   :  { %1701 = vmax.xlane.f32.xlu0 %v1700_v41  ;;  %v1646_v42 = vpop.f32.mrb[10].mxu1 }
 0x2d8   :  { %v1681_v43 = vsel %vm1669_vm4, %v1646_v42, -1000000.0  ;;  %v3219_v45 = vpop.f32.mrb[11].mxu1 }
 0x2d9   :  { %v1703_v46 = vsel %vm1041_vm2, %v1681_v43, -inf }
 0x2da   :  { %1704 = vmax.xlane.f32.xlu1 %v1703_v46 }
 0x2eb   :  { %751 = vrot.lane.b32.xlu1 %v3600_v30, %s3461_s28 }
 0x2ed   :  { %747 = vrot.lane.b32.xlu0 %v3576_v12, %s3461_s28 }
 0x357   :  { %v1684_v47 = vpop.xlane.xlu1 %1683 }
 0x358   :  { %v1706_v48 = vsub.f32 %v1674_v21, %v1684_v47  ;;  %v1690_v50 = vpop.xlane.xlu0 %1689 }
 0x359   :  { %v1708_v51 = vsub.f32 %v1676_v61, %v1690_v50 }
 0x35a   :  { %v1714_v52 = vmul.f32 1.442695, %v1706_v48 }
 0x35b   :  { %v1718_v59 = vmul.f32 1.442695, %v1708_v51 }
 0x35c   :  { %3359 = vpow2.f32 %v1714_v52  ;;  %v1687_v60 = vpop.xlane.xlu0 %1686 }
 0x35d   :  { %v1707_v55 = vsub.f32 %v1675_v20, %v1687_v60  ;;  %3361 = vpow2.f32 %v1718_v59 }
 0x35f   :  { %v1716_v56 = vmul.f32 1.442695, %v1707_v55  ;;  %v1693_v63 = vpop.xlane.xlu1 %1692 }
 0x360   :  { %v1709_v5 = vsub.f32 %v1677_v62, %v1693_v63  ;;  %v1696_v6 = vpop.xlane.xlu0 %1695 }
 0x361   :  { %3363 = vpow2.f32 %v1716_v56  ;;  %v1710_v7 = vsub.f32 %v1678_v29, %v1696_v6 }
 0x362   :  { %v1720_v30 = vmul.f32 1.442695, %v1709_v5 }
 0x363   :  { %v1722_v8 = vmul.f32 1.442695, %v1710_v7  ;;  %v1699_v9 = vpop.xlane.xlu1 %1698 }
 0x364   :  { %v1711_v12 = vsub.f32 %v1679_v35, %v1699_v9  ;;  %v1702_v13 = vpop.xlane.xlu0 %1701 }
 0x365   :  { %3365 = vpow2.f32 %v1722_v8  ;;  %v1712_v0 = vsub.f32 %v1680_v38, %v1702_v13 }
 0x366   :  { %v3360_v17 = vpop.eup %3359  ;;  %3367 = vpow2.f32 %v1720_v30  ;;  %v1724_v19 = vmul.f32 1.442695, %v1711_v12 }
 0x367   :  { %v1726_v53 = vmul.f32 1.442695, %v1712_v0  ;;  %v1705_v54 = vpop.xlane.xlu1 %1704  ;;  %v1730_v21 = vsel %vm1041_vm2, %v3360_v17, 0.0  ;;  %v3362_v22 = vpop.eup %3361 }
 0x368   :  { %v1713_v58 = vsub.f32 %v1681_v43, %v1705_v54  ;;  %1731 = vadd.xlane.f32.xlu0 %v1730_v21  ;;  %v1736_v23 = vsel %vm1041_vm2, %v3362_v22, 0.0  ;;  %v748_v14 = vpop.permute.xlu0 %747 }
 0x369   :  { %3369 = vpow2.f32 %v1726_v53 }
 0x36a   :  { %v1728_v61 = vmul.f32 1.442695, %v1713_v58  ;;  %3371 = vpow2.f32 %v1724_v19 }
 0x36b   :  { %v3364_v2 = vpop.eup %3363  ;;  %v752_v33 = vpop.permute.xlu1 %751 }
 0x36c   :  { %3373 = vpow2.f32 %v1728_v61  ;;  %1737 = vadd.xlane.f32.xlu0 %v1736_v23  ;;  %v1733_v24 = vsel %vm1041_vm2, %v3364_v2, 0.0 }
 0x36d   :  { %1734 = vadd.xlane.f32.xlu1 %v1733_v24 }
 0x36f   :  { %v3840_v25 = vpop.eup %3365 }
 0x370   :  { %v1742_v16 = vsel %vm1041_vm2, %v3840_v25, 0.0  ;;  %v3368_v20 = vpop.eup %3367 }
 0x371   :  { %1743 = vadd.xlane.f32.xlu1 %v1742_v16  ;;  %v1739_v27 = vsel %vm1041_vm2, %v3368_v20, 0.0 }
 0x373   :  { %v3844_v18 = vpop.eup %3369 }
 0x374   :  { %v1748_v28 = vsel %vm1041_vm2, %v3844_v18, 0.0  ;;  %v3849_v62 = vpop.eup %3371 }
 0x375   :  { %1740 = vadd.xlane.f32.xlu1 %v1739_v27  ;;  %1749 = vadd.xlane.f32.xlu0 %v1748_v28  ;;  %v1745_v29 = vsel %vm1041_vm2, %v3849_v62, 0.0 }
 0x376   :  { %v3851_v1 = vpop.eup %3373 }
 0x377   :  { %v1751_v4 = vsel %vm1041_vm2, %v3851_v1, 0.0 }
 0x379   :  { %1752 = vadd.xlane.f32.xlu1 %v1751_v4  ;;  %1746 = vadd.xlane.f32.xlu0 %v1745_v29 }
 0x38a   :  { %755 = vrot.lane.b32.xlu1 %v3619_v49, %s3461_s28 }
 0x38f   :  { %759 = vrot.lane.b32.xlu0 %v3617_v44, %s3461_s28 }
 0x3f5   :  { %v1732_v32 = vpop.xlane.xlu0 %1731 }
 0x3f6   :  { %3375 = vrcp.f32 %v1732_v32 }
 0x3f9   :  { %v1738_v34 = vpop.xlane.xlu0 %1737 }
 0x3fa   :  { %v1735_v35 = vpop.xlane.xlu1 %1734  ;;  %3377 = vrcp.f32 %v1738_v34 }
 0x3fb   :  { %3379 = vrcp.f32 %v1735_v35 }
 0x3fe   :  { %v1744_v36 = vpop.xlane.xlu1 %1743 }
 0x400   :  { %v3376_v37 = vpop.eup %3375 }
 0x401   :  { %v1762_v38 = vmul.f32 %v3376_v37, %v3360_v17 }
 0x402   :  { %v1741_v39 = vpop.xlane.xlu1 %1740  ;;  %v1750_v40 = vpop.xlane.xlu0 %1749 }
 0x403   :  { %3381 = vrcp.f32 %v1741_v39  ;;  %3223 = vmatmul.mubr.msk.f32.vlgmr.msra.gmra.mrb[6].mxu0 %vm1041_vm2, %v1762_v38 }
 0x404   :  { %v3378_v49 = vpop.eup %3377  ;;  %3231 = vmatpush3.msra.mxu0 %v971_v3  ;;  %3232 = vmatprep.mubr.msk.f32.mxu0 %vm3460_vm1, %v3459_v57  ;;  %3383 = vrcp.f32 %v1744_v36 }
 0x405   :  { %v3380_v44 = vpop.eup %3379  ;;  %v1764_v41 = vmul.f32 %v3378_v49, %v3362_v22  ;;  %3240 = vmatprep.subr.mxu0 %v3459_v57 }
 0x406   :  { %v1763_v42 = vmul.f32 %v3380_v44, %v3364_v2  ;;  %v1753_v43 = vpop.xlane.xlu1 %1752  ;;  %v1747_v45 = vpop.xlane.xlu0 %1746 }
 0x407   :  { %3233 = vmatmul.mubr.msk.f32.vlgmr.msra.gmra.mrb[8].mxu0 %vm1041_vm2, %v1764_v41  ;;  %3385 = vrcp.f32 %v1747_v45 }
 0x408   :  { %3228 = vmatmul.mubr.msk.f32.vlgmr.msra.gmra.mrb[12].mxu1 %vm1041_vm2, %v1763_v42  ;;  %3242 = vmatprep.mubr.msk.f32.mxu0 %vm3460_vm1, %v3459_v57  ;;  %3387 = vrcp.f32 %v1750_v40 }
 0x409   :  { %3236 = vmatpush3.msra.mxu1 %v972_v15  ;;  %3237 = vmatprep.mubr.msk.f32.mxu1 %vm3460_vm1, %v3459_v57  ;;  %3389 = vrcp.f32 %v1753_v43 }
 0x40a   :  { %v756_v3 = vpop.permute.xlu1 %755  ;;  %v760_v46 = vpop.permute.xlu0 %759  ;;  %3245 = vmatprep.subr.mxu1 %v3459_v57 }
 0x40b   :  { %v837_v47 = vcombine.low %v748_v14, %v756_v3  ;;  %v838_v48 = vcombine.high %v748_v14, %v756_v3  ;;  %v853_v50 = vcombine.low %v752_v33, %v760_v46  ;;  %v854_v51 = vcombine.high %v752_v33, %v760_v46 }
 0x40d   :  { %v3382_v52 = vpop.eup %3381  ;;  %v845_v59 = vrot.slane %v837_v47, %v3593_v26  ;;  %v852_v60 = vrot.slane %v838_v48, %v3593_v26  ;;  %v861_v55 = vrot.slane %v853_v50, %v3593_v26  ;;  %v868_v10 = vrot.slane %v854_v51, %v3593_v26 }
 0x40e   :  { %v1765_v11 = vmul.f32 %v3382_v52, %v3368_v20  ;;  %v3384_v2 = vpop.eup %3383 }
 0x40f   :  { %v869_v15 = vcombine.low %v845_v59, %v861_v55  ;;  %v870_v56 = vcombine.high %v845_v59, %v861_v55  ;;  %v885_v63 = vcombine.low %v852_v60, %v868_v10  ;;  %v886_v5 = vcombine.high %v852_v60, %v868_v10 }
 0x410   :  { %3238 = vmatmul.mubr.msk.f32.vlgmr.msra.gmra.mrb[14].mxu1 %vm1041_vm2, %v1765_v11  ;;  %v1766_v14 = vmul.f32 %v3384_v2, %v3840_v25 }
 0x411   :  { %v877_v6 = vrot.slane %v869_v15, %v3603_v31  ;;  %v884_v7 = vrot.slane %v870_v56, %v3603_v31  ;;  %v893_v30 = vrot.slane %v885_v63, %v3603_v31  ;;  %3247 = vmatprep.mubr.msk.f32.mxu1 %vm3460_vm1, %v3459_v57  ;;  %v900_v8 = vrot.slane %v886_v5, %v3603_v31  ;;  %v3386_v24 = vpop.eup %3385 }
 0x412   :  { %v3388_v29 = vpop.eup %3387  ;;  %v1767_v32 = vmul.f32 %v3386_v24, %v3849_v62 }
 0x413   :  { %v973_v9 = vcombine.low %v877_v6, %v884_v7  ;;  %v3066_v12 = vcombine.high %v877_v6, %v884_v7  ;;  %v989_v13 = vcombine.low %v893_v30, %v900_v8  ;;  %v3067_v0 = vcombine.high %v893_v30, %v900_v8  ;;  %v3390_v33 = vpop.eup %3389 }
 0x414   :  { %v1768_v36 = vmul.f32 %v3388_v29, %v3844_v18  ;;  %v1769_v37 = vmul.f32 %v3390_v33, %v3851_v1 }
 0x415   :  { %v980_v17 = vrot.slane %v973_v9, %v3593_v26  ;;  %v988_v19 = vrot.slane %v3066_v12, %v3593_v26  ;;  %v996_v53 = vrot.slane %v989_v13, %v3593_v26  ;;  %v1004_v54 = vrot.slane %v3067_v0, %v3593_v26 }
 0x417   :  { %v1005_v21 = vcombine.low %v980_v17, %v988_v19  ;;  %v1006_v22 = vcombine.high %v980_v17, %v988_v19  ;;  %v1021_v58 = vcombine.low %v996_v53, %v1004_v54  ;;  %v1022_v61 = vcombine.high %v996_v53, %v1004_v54 }
 0x419   :  { %v1013_v23 = vrot.slane %v1005_v21, %v3603_v31  ;;  %v1029_v16 = vrot.slane %v1021_v58, %v3603_v31  ;;  %v1020_v20 = vrot.slane %v1006_v22, %v3603_v31  ;;  %v1036_v27 = vrot.slane %v1022_v61, %v3603_v31 }
 0x41b   :  { %v1037_v28 = vcombine.low %v1013_v23, %v1029_v16  ;;  %v1038_v4 = vcombine.high %v1013_v23, %v1029_v16  ;;  %v1039_v34 = vcombine.low %v1020_v20, %v1036_v27  ;;  %v1040_v35 = vcombine.high %v1020_v20, %v1036_v27 }
 0x41d   :  { %3241 = vmatpush3.msra.mxu0 %v1037_v28  ;;  %3246 = vmatpush3.msra.mxu1 %v1038_v4 }
 0x41e   :  { %3243 = vmatmul.mubr.msk.f32.vlgmr.msra.gmra.mrb[10].mxu0 %vm1041_vm2, %v1766_v14  ;;  %3248 = vmatmul.mubr.msk.f32.vlgmr.msra.gmra.mrb[16].mxu1 %vm1041_vm2, %v1767_v32 }
 0x41f   :  { %3250 = vmatprep.subr.mxu0 %v3459_v57  ;;  %3255 = vmatprep.subr.mxu1 %v3459_v57 }
 0x420   :  { %3251 = vmatpush3.msra.mxu0 %v1039_v34  ;;  %3256 = vmatpush3.msra.mxu1 %v1040_v35 }
 0x421   :  { %3252 = vmatprep.mubr.msk.f32.mxu0 %vm3460_vm1, %v3459_v57  ;;  %3257 = vmatprep.mubr.msk.f32.mxu1 %vm3460_vm1, %v3459_v57 }
 0x422   :  { %3253 = vmatmul.mubr.msk.f32.vlgmr.msra.gmra.mrb[12].mxu0 %vm1041_vm2, %v1768_v36  ;;  %3258 = vmatmul.mubr.msk.f32.vlgmr.msra.gmra.mrb[18].mxu1 %vm1041_vm2, %v1769_v37 }
 0x4d6   :  { %v1839_v25 = vpop.f32.mrb[6].mxu0 }
 0x4d7   :  { %v3224_v62 = vpop.f32.mrb[7].mxu0 }
 0x4da   :  { %v1985_v38 = vpop.f32.mrb[8].mxu0 }
 0x4db   :  { %v1912_v39 = vpop.f32.mrb[12].mxu1  ;;  %v2354_v40 = vcombine.low %v1839_v25, %v1985_v38  ;;  %v2355_v18 = vcombine.high %v1839_v25, %v1985_v38  ;;  %v3234_v49 = vpop.f32.mrb[9].mxu0  ;;  %v2658_v38 = vld [vmem:[%s4064_s4] sm:$0xff] }
 0x4dc   :  { %v3229_v1 = vpop.f32.mrb[13].mxu1 }
 0x4dd   :  { %v2362_v45 = vrot.slane %v2354_v40, %v3593_v26  ;;  %v2369_v57 = vrot.slane %v2355_v18, %v3593_v26 }
 0x4e3   :  { %v2058_v44 = vpop.f32.mrb[14].mxu1 }
 0x4e4   :  { %v2370_v41 = vcombine.low %v1912_v39, %v2058_v44  ;;  %v2371_v42 = vcombine.high %v1912_v39, %v2058_v44  ;;  %v3239_v43 = vpop.f32.mrb[15].mxu1  ;;  %v2659_v39 = vld [vmem:[%s4064_s4 + $0x8] sm:$0xff] }
 0x4e5   :  { %v3309_v44 = vpack.c.bf16 %v2659_v39, %v2658_v38  ;;  %v2798_v38 = vld [vmem:[%s4068_s8 + $0x8] sm:$0xff] }
 0x4e6   :  { %v2378_v3 = vrot.slane %v2370_v41, %v3593_v26  ;;  %v2385_v46 = vrot.slane %v2371_v42, %v3593_v26 }
 0x4e7   :  { %3310 = vmatprep.subr.bf16.mxu0 %v3309_v44 }
 0x4e8   :  { %v2386_v47 = vcombine.low %v2362_v45, %v2378_v3  ;;  %v2387_v48 = vcombine.high %v2362_v45, %v2378_v3  ;;  %v2402_v50 = vcombine.low %v2369_v57, %v2385_v46  ;;  %v2403_v51 = vcombine.high %v2369_v57, %v2385_v46  ;;  %v2660_v57 = vld [vmem:[%s4064_s4 + $0x10] sm:$0xff]  ;;  %v2661_v3 = vld [vmem:[%s4064_s4 + $0x18] sm:$0xff]  ;;  %3312 = vmatpush3.bf16.msra.mxu0 %v3309_v44  ;;  %v2892_v44 = vld [vmem:[%s4070_s10 + $0x8] sm:$0xff] }
 0x4ea   :  { %v2394_v52 = vrot.slane %v2386_v47, %v3603_v31  ;;  %v2401_v59 = vrot.slane %v2387_v48, %v3603_v31  ;;  %v2410_v60 = vrot.slane %v2402_v50, %v3603_v31  ;;  %v2417_v55 = vrot.slane %v2403_v51, %v3603_v31 }
 0x4eb   :  { %v3313_v51 = vpack.c.bf16 %v2661_v3, %v2660_v57  ;;  %v2895_v57 = vld [vmem:[%s4070_s10 + $0x20] sm:$0xff]  ;;  %v2896_v3 = vld [vmem:[%s4070_s10 + $0x28] sm:$0xff] }
 0x4ec   :  { %v2490_v10 = vcombine.low %v2394_v52, %v2401_v59  ;;  %v3092_v11 = vcombine.high %v2394_v52, %v2401_v59  ;;  %v2506_v15 = vcombine.low %v2410_v60, %v2417_v55  ;;  %v3093_v56 = vcombine.high %v2410_v60, %v2417_v55 }
 0x4ed   :  { %3314 = vmatprep.subr.bf16.mxu0 %v3313_v51 }
 0x4ee   :  { %v2497_v63 = vrot.slane %v2490_v10, %v3593_v26  ;;  %v2505_v5 = vrot.slane %v3092_v11, %v3593_v26  ;;  %v2513_v6 = vrot.slane %v2506_v15, %v3593_v26  ;;  %v2521_v7 = vrot.slane %v3093_v56, %v3593_v26  ;;  %3316 = vmatpush3.bf16.msra.mxu0 %v3313_v51 }
 0x4f0   :  { %v2522_v30 = vcombine.low %v2497_v63, %v2505_v5  ;;  %v2538_v8 = vcombine.low %v2513_v6, %v2521_v7  ;;  %v2523_v9 = vcombine.high %v2497_v63, %v2505_v5  ;;  %v2539_v12 = vcombine.high %v2513_v6, %v2521_v7 }
 0x4f1   :  { %v2131_v13 = vpop.f32.mrb[10].mxu0  ;;  %v2204_v0 = vpop.f32.mrb[16].mxu1 }
 0x4f2   :  { %v3924_v17 = vrot.slane %v2522_v30, %v3603_v31  ;;  %v3927_v19 = vrot.slane %v2538_v8, %v3603_v31  ;;  %v2537_v53 = vrot.slane %v2523_v9, %v3603_v31  ;;  %v2553_v54 = vrot.slane %v2539_v12, %v3603_v31  ;;  %v3244_v21 = vpop.f32.mrb[11].mxu0  ;;  %v3249_v22 = vpop.f32.mrb[17].mxu1 }
 0x4f4   :  { %v2555_v58 = vcombine.high %v3924_v17, %v3927_v19  ;;  %v2554_v61 = vcombine.low %v3924_v17, %v3927_v19  ;;  %v2556_v2 = vcombine.low %v2537_v53, %v2553_v54  ;;  %v2557_v23 = vcombine.high %v2537_v53, %v2553_v54  ;;  %v3096_v17 = vld [vmem:[%s4065_s5] ss:$0 sm:$0xff] }
 0x4f5   :  { %v2277_v24 = vpop.f32.mrb[12].mxu0  ;;  %v2350_v16 = vpop.f32.mrb[18].mxu1 }
 0x4f6   :  { %2628 = vrot.lane.b32.xlu1 %v2555_v58, %s3451_s24  ;;  %v2422_v20 = vcombine.low %v2131_v13, %v2277_v24  ;;  %v2423_v27 = vcombine.high %v2131_v13, %v2277_v24  ;;  %v2438_v28 = vcombine.low %v2204_v0, %v2350_v16  ;;  %v2439_v4 = vcombine.high %v2204_v0, %v2350_v16  ;;  %v3254_v29 = vpop.f32.mrb[13].mxu0  ;;  %v3259_v14 = vpop.f32.mrb[19].mxu1  ;;  %v3400_v16 = vld [vmem:[#allocation2] sm:$0xff] }
 0x4f8   :  { %v2430_v32 = vrot.slane %v2422_v20, %v3593_v26  ;;  %v2437_v33 = vrot.slane %v2423_v27, %v3593_v26  ;;  %v2446_v34 = vrot.slane %v2438_v28, %v3593_v26  ;;  %v2453_v35 = vrot.slane %v2439_v4, %v3593_v26 }
 0x4fa   :  { %2636 = vrot.lane.b32.xlu1 %v2556_v2, %s3462_s0  ;;  %v2454_v36 = vcombine.low %v2430_v32, %v2446_v34  ;;  %v2455_v37 = vcombine.high %v2430_v32, %v2446_v34  ;;  %v2470_v25 = vcombine.low %v2437_v33, %v2453_v35  ;;  %v2471_v62 = vcombine.high %v2437_v33, %v2453_v35 }
 0x4fc   :  { %v2462_v40 = vrot.slane %v2454_v36, %v3603_v31  ;;  %v2469_v18 = vrot.slane %v2455_v37, %v3603_v31  ;;  %v2478_v49 = vrot.slane %v2470_v25, %v3603_v31  ;;  %v2485_v1 = vrot.slane %v2471_v62, %v3603_v31  ;;  %v2797_v62 = vld [vmem:[%s4068_s8] sm:$0xff] }
 0x4fd   :  { %v3317_v39 = vpack.c.bf16 %v2798_v38, %v2797_v62 }
 0x4fe   :  { %2644 = vrot.lane.b32.xlu1 %v2557_v23, %s3463_s18  ;;  %v2558_v41 = vcombine.low %v2462_v40, %v2469_v18  ;;  %v3094_v42 = vcombine.high %v2462_v40, %v2469_v18  ;;  %v2574_v43 = vcombine.low %v2478_v49, %v2485_v1  ;;  %v3095_v45 = vcombine.high %v2478_v49, %v2485_v1  ;;  %v3399_v23 = vld [vmem:[#allocation2 + $0x8] sm:$0xff]  ;;  %v2800_v18 = vld [vmem:[%s4068_s8 + $0x18] sm:$0xff]  ;;  %v2891_v1 = vld [vmem:[%s4070_s10] sm:$0xff] }
 0x4ff   :  { %v2799_v40 = vld [vmem:[%s4068_s8 + $0x10] sm:$0xff]  ;;  %3318 = vmatprep.subr.bf16.mxu1 %v3317_v39 }
 0x500   :  { %v2565_v46 = vrot.slane %v2558_v41, %v3593_v26  ;;  %v2573_v47 = vrot.slane %v3094_v42, %v3593_v26  ;;  %v2581_v48 = vrot.slane %v2574_v43, %v3593_v26  ;;  %v2589_v50 = vrot.slane %v3095_v45, %v3593_v26  ;;  %3320 = vmatpush3.bf16.msra.mxu1 %v3317_v39  ;;  %v2893_v41 = vld [vmem:[%s4070_s10 + $0x10] sm:$0xff]  ;;  %v2894_v43 = vld [vmem:[%s4070_s10 + $0x18] sm:$0xff] }
 0x501   :  { %v3321_v49 = vpack.c.bf16 %v2800_v18, %v2799_v40  ;;  %v3325_v42 = vpack.c.bf16 %v2892_v44, %v2891_v1  ;;  %v3329_v45 = vpack.c.bf16 %v2894_v43, %v2893_v41  ;;  %v3107_v40 = vld [vmem:[%s4072_s12] ss:$0 sm:$0xff] }
 0x502   :  { %v2590_v52 = vcombine.low %v2565_v46, %v2573_v47  ;;  %v2606_v59 = vcombine.low %v2581_v48, %v2589_v50  ;;  %v2591_v60 = vcombine.high %v2565_v46, %v2573_v47  ;;  %v2607_v55 = vcombine.high %v2581_v48, %v2589_v50  ;;  %v3108_v44 = vld [vmem:[%s4073_s13] ss:$0 sm:$0xff] }
 0x503   :  { %3322 = vmatprep.subr.bf16.mxu1 %v3321_v49  ;;  %3326 = vmatprep.subr.bf16.mxu0 %v3325_v42  ;;  %v3333_v46 = vpack.c.bf16 %v2896_v3, %v2895_v57 }
 0x504   :  { %v2598_v10 = vrot.slane %v2590_v52, %v3603_v31  ;;  %v2614_v11 = vrot.slane %v2606_v59, %v3603_v31  ;;  %v2605_v15 = vrot.slane %v2591_v60, %v3603_v31  ;;  %v2621_v56 = vrot.slane %v2607_v55, %v3603_v31  ;;  %3324 = vmatpush3.bf16.msra.mxu1 %v3321_v49  ;;  %v3099_v55 = vld [vmem:[%s4066_s6] ss:$0 sm:$0xff] }
 0x506   :  { %v2623_v63 = vcombine.high %v2598_v10, %v2614_v11  ;;  %v2622_v5 = vcombine.low %v2598_v10, %v2614_v11  ;;  %v2624_v6 = vcombine.low %v2605_v15, %v2621_v56  ;;  %v2625_v26 = vcombine.high %v2605_v15, %v2621_v56  ;;  %v3100_v56 = vld [vmem:[%s4067_s7] ss:$0 sm:$0xff] }
 0x508   :  { %2630 = vrot.lane.b32.xlu0 %v2623_v63, %s3451_s24 }
 0x50c   :  { %2638 = vrot.lane.b32.xlu0 %v2624_v6, %s3462_s0 }
 0x510   :  { %2646 = vrot.lane.b32.xlu0 %v2625_v26, %s3463_s18 }
 0x568   :  { %v2629_v7 = vpop.permute.xlu1 %2628 }
 0x569   :  { %v2650_v31 = vsel %vm1041_vm2, %v2554_v61, %v2629_v7  ;;  %v2897_v7 = vld [vmem:[%s4070_s10 + $0x30] sm:$0xff] }
 0x56c   :  { %v2637_v30 = vpop.permute.xlu1 %2636 }
 0x56d   :  { %v2653_v8 = vsel %vm2652_vm5, %v2650_v31, %v2637_v30  ;;  %v2898_v30 = vld [vmem:[%s4070_s10 + $0x38] sm:$0xff] }
 0x56e   :  { %v3337_v31 = vpack.c.bf16 %v2898_v30, %v2897_v7 }
 0x570   :  { %v2645_v9 = vpop.permute.xlu1 %2644 }
 0x571   :  { %v2656_v12 = vsel %vm2655_vm6, %v2653_v8, %v2645_v9  ;;  %v3101_v8 = vld [vmem:[%s4069_s9] ss:$0 sm:$0xff] }
 0x572   :  { %3268 = vmatprep.mubr.msk.f32.mxu0 %vm75_vm0, %v2656_v12 }
 0x57a   :  { %v2631_v13 = vpop.permute.xlu0 %2630 }
 0x57b   :  { %v2651_v53 = vsel %vm1041_vm2, %v2622_v5, %v2631_v13 }
 0x57e   :  { %v2639_v0 = vpop.permute.xlu0 %2638 }
 0x57f   :  { %v2654_v54 = vsel %vm2652_vm5, %v2651_v53, %v2639_v0 }
 0x582   :  { %v2647_v21 = vpop.permute.xlu0 %2646 }
 0x583   :  { %v2657_v22 = vsel %vm2655_vm6, %v2654_v54, %v2647_v21  ;;  %v3104_v21 = vld [vmem:[%s4071_s11] ss:$0 sm:$0xff] }
 0x584   :  { %3269 = vmatmul.mubr.msk.f32.vlgmr.msra.gmra.mrb[14].mxu0 %vm75_vm0, %v2657_v22 }
 0x585   :  { %3328 = vmatpush3.bf16.msra.mxu0 %v3325_v42 }
 0x586   :  { %3330 = vmatprep.subr.bf16.mxu0 %v3329_v45 }
 0x589   :  { %3332 = vmatpush3.bf16.msra.mxu0 %v3329_v45 }
 0x58a   :  { %3334 = vmatprep.subr.bf16.mxu0 %v3333_v46 }
 0x58d   :  { %3336 = vmatpush3.bf16.msra.mxu0 %v3333_v46 }
 0x58e   :  { %3338 = vmatprep.subr.bf16.mxu0 %v3337_v31 }
 0x591   :  { %3340 = vmatpush3.bf16.msra.mxu0 %v3337_v31 }
 0x657   :  { %v3270_v19 = vpop.f32.mrb[14].mxu0 }
 0x658   :  { %v2747_v58 = vadd.f32 %v3270_v19, %v3096_v17  ;;  %v2741_v61 = vpop.f32.mrb[15].mxu0 }
 0x659   :  { %v2742_v2 = vadd.f32 %v3096_v17, %v2741_v61 }
 0x65a   :  { %v2751_v24 = vadd.f32 %v3399_v23, %v2747_v58 }
 0x65b   :  { %v2750_v20 = vadd.f32 %v3400_v16, %v2742_v2 }
 0x65c   :  { %v2757_v27 = vsel %vm75_vm0, %v2751_v24, 0.0 }
 0x65d   :  { %2758 = vadd.xlane.f32.xlu0 %v2757_v27  ;;  %v2754_v28 = vsel %vm75_vm0, %v2750_v20, 0.0 }
 0x65e   :  { %2755 = vadd.xlane.f32.xlu1 %v2754_v28 }
 0x6ea   :  { %v2759_v4 = vpop.xlane.xlu0 %2758 }
 0x6eb   :  { %v2762_v29 = vmul.f32 0.03125, %v2759_v4  ;;  %v2756_v14 = vpop.xlane.xlu1 %2755 }
 0x6ec   :  { %v2761_v32 = vmul.f32 0.03125, %v2756_v14 }
 0x6ed   :  { %v2764_v33 = vsub.f32 %v2751_v24, %v2762_v29 }
 0x6ee   :  { %v2763_v34 = vsub.f32 %v2750_v20, %v2761_v32 }
 0x6ef   :  { %v2766_v35 = vmul.f32 %v2764_v33, %v2764_v33 }
 0x6f0   :  { %v2765_v36 = vmul.f32 %v2763_v34, %v2763_v34 }
 0x6f1   :  { %v2770_v37 = vsel %vm75_vm0, %v2766_v35, 0.0 }
 0x6f2   :  { %2771 = vadd.xlane.f32.xlu1 %v2770_v37  ;;  %v2767_v25 = vsel %vm75_vm0, %v2765_v36, 0.0 }
 0x6f3   :  { %2768 = vadd.xlane.f32.xlu0 %v2767_v25 }
 0x77f   :  { %v2772_v47 = vpop.xlane.xlu1 %2771 }
 0x780   :  { %v2774_v48 = vmul.f32 0.03125, %v2772_v47  ;;  %v2769_v50 = vpop.xlane.xlu0 %2768 }
 0x781   :  { %v2773_v51 = vmul.f32 0.03125, %v2769_v50 }
 0x782   :  { %v2776_v52 = vadd.f32 1e-05, %v2774_v48 }
 0x783   :  { %v2775_v59 = vadd.f32 1e-05, %v2773_v51 }
 0x784   :  { %3391 = vrsqrt.f32 %v2776_v52 }
 0x785   :  { %3393 = vrsqrt.f32 %v2775_v59 }
 0x78e   :  { %v3392_v60 = vpop.eup %3391 }
 0x78f   :  { %v3394_v10 = vpop.eup %3393  ;;  %v2780_v11 = vmul.f32 %v3392_v60, %v2764_v33 }
 0x790   :  { %v2779_v15 = vmul.f32 %v3394_v10, %v2763_v34 }
 0x791   :  { %v2788_v63 = vmul.f32 %v3099_v55, %v2780_v11 }
 0x792   :  { %v2787_v5 = vmul.f32 %v3099_v55, %v2779_v15 }
 0x793   :  { %v2796_v26 = vadd.f32 %v3100_v56, %v2788_v63 }
 0x794   :  { %v2795_v6 = vadd.f32 %v3100_v56, %v2787_v5 }
 0x796   :  { %3279 = vmatprep.mubr.msk.f32.mxu1 %vm75_vm0, %v2795_v6 }
 0x797   :  { %3280 = vmatmul.mubr.msk.f32.vlgmr.msra.gmra.mrb[20].mxu1 %vm75_vm0, %v2796_v26 }
 0x86a   :  { %v3281_v9 = vpop.f32.mrb[20].mxu1 }
 0x86b   :  { %v2886_v12 = vadd.f32 %v3281_v9, %v3101_v8  ;;  %v2880_v13 = vpop.f32.mrb[21].mxu1 }
 0x86c   :  { %v2881_v0 = vadd.f32 %v3101_v8, %v2880_v13 }
 0x86d   :  { %v2890_v54 = vmax.f32 %v2886_v12, 0.0 }
 0x86e   :  { %v2889_v53 = vmax.f32 %v2881_v0, 0.0 }
 0x870   :  { %3298 = vmatprep.mubr.msk.f32.mxu0 %vm2906_vm7, %v2889_v53 }
 0x871   :  { %3299 = vmatmul.mubr.msk.f32.vlgmr.msra.gmra.mrb[16].mxu0 %vm2906_vm7, %v2890_v54 }
 0x944   :  { %v3300_v22 = vpop.f32.mrb[16].mxu0 }
 0x945   :  { %v2985_v17 = vadd.f32 %v3300_v22, %v3104_v21  ;;  %v2979_v19 = vpop.f32.mrb[17].mxu0 }
 0x946   :  { %v2980_v58 = vadd.f32 %v3104_v21, %v2979_v19 }
 0x947   :  { %v2989_v61 = vadd.f32 %v2985_v17, %v2796_v26 }
 0x948   :  { %v2988_v2 = vadd.f32 %v2980_v58, %v2795_v6 }
 0x949   :  { %v2995_v23 = vsel %vm75_vm0, %v2989_v61, 0.0 }
 0x94a   :  { %2996 = vadd.xlane.f32.xlu1 %v2995_v23  ;;  %v2992_v24 = vsel %vm75_vm0, %v2988_v2, 0.0 }
 0x94b   :  { %2993 = vadd.xlane.f32.xlu0 %v2992_v24 }
 0x9d7   :  { %v2997_v16 = vpop.xlane.xlu1 %2996 }
 0x9d8   :  { %v2999_v20 = vmul.f32 0.03125, %v2997_v16  ;;  %v2994_v27 = vpop.xlane.xlu0 %2993 }
 0x9d9   :  { %v2998_v28 = vmul.f32 0.03125, %v2994_v27 }
 0x9da   :  { %v3001_v4 = vsub.f32 %v2989_v61, %v2999_v20 }
 0x9db   :  { %v3000_v29 = vsub.f32 %v2988_v2, %v2998_v28 }
 0x9dc   :  { %v3003_v14 = vmul.f32 %v3001_v4, %v3001_v4 }
 0x9dd   :  { %v3002_v32 = vmul.f32 %v3000_v29, %v3000_v29 }
 0x9de   :  { %v3007_v33 = vsel %vm75_vm0, %v3003_v14, 0.0 }
 0x9df   :  { %3008 = vadd.xlane.f32.xlu1 %v3007_v33  ;;  %v3004_v34 = vsel %vm75_vm0, %v3002_v32, 0.0 }
 0x9e0   :  { %3005 = vadd.xlane.f32.xlu0 %v3004_v34 }
 0xa6c   :  { %v3009_v35 = vpop.xlane.xlu1 %3008 }
 0xa6d   :  { %v3011_v36 = vmul.f32 0.03125, %v3009_v35  ;;  %v3006_v37 = vpop.xlane.xlu0 %3005 }
 0xa6e   :  { %v3010_v25 = vmul.f32 0.03125, %v3006_v37 }
 0xa6f   :  { %v3013_v62 = vadd.f32 1e-05, %v3011_v36 }
 0xa70   :  { %v3012_v38 = vadd.f32 1e-05, %v3010_v25 }
 0xa71   :  { %3395 = vrsqrt.f32 %v3013_v62 }
 0xa72   :  { %3397 = vrsqrt.f32 %v3012_v38 }
 0xa7b   :  { %v3396_v39 = vpop.eup %3395 }
 0xa7c   :  { %v3398_v18 = vpop.eup %3397  ;;  %v3017_v49 = vmul.f32 %v3396_v39, %v3001_v4 }
 0xa7d   :  { %v3016_v1 = vmul.f32 %v3398_v18, %v3000_v29 }
 0xa7e   :  { %v3025_v41 = vmul.f32 %v3107_v40, %v3017_v49 }
 0xa7f   :  { %v3024_v42 = vmul.f32 %v3107_v40, %v3016_v1 }
 0xa80   :  { %v3033_v43 = vadd.f32 %v3108_v44, %v3025_v41 }
 0xa81   :  { %v3032_v45 = vadd.f32 %v3108_v44, %v3024_v42 }
 0xa82   :  { %3035 = vst.msk [vmem:[#allocation5 + $0x8] sm:$0xff] %vm75_vm0, %v3033_v43 }
 0xa83   :  { %3034 = vst.msk [vmem:[#allocation5] sm:$0xff] %vm75_vm0, %v3032_v45 }
 0xa84   :  { %3434 = shalt.err (!%p3431_p12)
}
 0xa85   :  { %s3435_s18 = scalar_lea.hbm %s4074_s14, 256 }
 0xa86   :  { %p3436_p13 = scmp.ne.s32.totalorder %s4074_s14, %s3435_s18  ;;  %p3439_p0 = scmp.lt.u32.totalorder %s3435_s18, %s4074_s14 }
 0xa88   :  { %p3441_p1 = pnand %p3439_p0, %p3436_p13 }
 0xa8a   :  { %3444 = shalt.err (!%p3441_p1)
}
 0xa8b   :  { %3047 = dma.vmem_to_hbm [thread:$0]  %s3042_s16, 256, %s4074_s14, [#allocation4], %s3450_s23, %s3450_s23, %s3451_s24  }
 0xa8c   :  { %3447 = dma.done.wait [#allocation4], 256  }
 0xa8d   :  { %3448 = vsyncadd [#allocation4], 4294967040 }
 0xa8e   :  { %3051 = vsyncpa [#allocation3], 1 }
 0xa8f   :  { %3052 = vsyncpa [#allocation4], 1 }

</bundles_post_ra>
